<compile_context>
chip_gen: v7x
topology: tpu7x:2x2x1
jax: 0.10.0
libtpu: 0.0.40
codegen_flags: <defaults>
</compile_context>

<pallas_src>
import math

import numpy as np
import jax
import jax.numpy as jnp
from jax import lax
from jax.experimental import pallas as pl
from jax.experimental.pallas import tpu as pltpu


# ----------------------------- model configuration -----------------------------
VOCAB = 64
SEG_TYPES = 3
SEG_PAD = 8            # segment one-hot padded to a sublane-friendly width
MAX_POS = 64
HIDDEN = 32
HEADS = 2
HEAD_DIM = HIDDEN // HEADS
FFN = 64
LAYERS = 2
BATCH = 2
SEQ = 8
BS = BATCH * SEQ       # fused batch*seq row dimension (16)
LANES = 128

LN_EPS = 1e-6
ATTN_SCALE = 1.0 / math.sqrt(HEAD_DIM)
MXU_DTYPE = jnp.bfloat16      # matmul operand dtype (accumulate in f32)
NEG_INF = -1e9


# ----------------------------- slab layouts -------------------------------------
def _layout(entries, align):
    """Row offsets for sub-tensors packed into a (rows, 128) slab, tile-aligned."""
    offs, r = {}, 0
    for name, (nrows, _ncols) in entries:
        offs[name] = r
        r += ((nrows + align - 1) // align) * align
    return offs, r


# bf16 MXU-weight slab (row alignment 16 for bf16 (16,128) tiles)
_W_SHAPES = [("wemb", (VOCAB, HIDDEN)), ("semb", (SEG_PAD, HIDDEN))]
for _l in range(LAYERS):
    _W_SHAPES += [
        (f"wqkv{_l}", (HIDDEN, 3 * HIDDEN)),
        (f"wo{_l}", (HIDDEN, HIDDEN)),
        (f"w1{_l}", (HIDDEN, FFN)),
        (f"w2{_l}", (FFN, HIDDEN)),
    ]
_W_DICT = dict(_W_SHAPES)
W_OFF, W_ROWS = _layout(_W_SHAPES, 16)

# f32 params slab (row alignment 8 for f32 (8,128) tiles)
_P_SHAPES = [("pos", (SEQ, HIDDEN)), ("emb_g", (1, HIDDEN)), ("emb_b", (1, HIDDEN))]
for _l in range(LAYERS):
    _P_SHAPES += [
        (f"bqkv{_l}", (1, 3 * HIDDEN)),
        (f"bo{_l}", (1, HIDDEN)),
        (f"ln1g{_l}", (1, HIDDEN)), (f"ln1b{_l}", (1, HIDDEN)),
        (f"b1{_l}", (1, FFN)), (f"b2{_l}", (1, HIDDEN)),
        (f"ln2g{_l}", (1, HIDDEN)), (f"ln2b{_l}", (1, HIDDEN)),
    ]
_P_DICT = dict(_P_SHAPES)
P_OFF, P_ROWS = _layout(_P_SHAPES, 8)


# ----------------------------- in-kernel helpers (f32) --------------------------
def _layernorm(x, g, b):
    mu = jnp.mean(x, axis=-1, keepdims=True)
    xc = x - mu
    var = jnp.mean(xc * xc, axis=-1, keepdims=True)
    return xc * lax.rsqrt(var + LN_EPS) * g + b


def _gelu(x):
    # tanh-approx GELU (same variant as the previous implementation).
    # TODO(synk): switch to the exact erf-based GELU if the reference encoder uses nn.GELU.
    c = math.sqrt(2.0 / math.pi)
    return 0.5 * x * (1.0 + jnp.tanh(c * (x + 0.044715 * x * x * x)))


# ----------------------------- fused encoder kernel -----------------------------
def _encoder_kernel(ids_ref, bias_ref, w_ref, p_ref, o_ref):
    # Zero-cost static views into the packed slabs (all offsets tile-aligned).
    def wget(name):
        r = W_OFF[name]
        nr, nc = _W_DICT[name]
        return w_ref[r:r + nr, :nc]          # bf16

    def pget(name):
        r = P_OFF[name]
        nr, nc = _P_DICT[name]
        return p_ref[r:r + nr, :nc]          # f32

    ids = ids_ref[...]                        # (BS, 2) int32: [:,0]=src, [:,1]=seg
    src = ids[:, 0:1]
    seg = ids[:, 1:2]

    # ---- fused embedding: gathers as one-hot bf16 matmuls (one-hot exact in bf16) ----
    src_oh = (lax.broadcasted_iota(jnp.int32, (BS, VOCAB), 1) == src).astype(MXU_DTYPE)
    seg_oh = (lax.broadcasted_iota(jnp.int32, (BS, SEG_PAD), 1) == seg).astype(MXU_DTYPE)
    emb = jnp.dot(src_oh, wget("wemb"), preferred_element_type=jnp.float32)
    emb = emb + jnp.dot(seg_oh, wget("semb"), preferred_element_type=jnp.float32)
    pos = pget("pos")                                             # (SEQ, H) f32
    emb = emb + jnp.concatenate([pos] * BATCH, axis=0)            # tiled over batch
    h = _layernorm(emb, pget("emb_g"), pget("emb_b"))             # (BS, H) f32 residual

    bias = bias_ref[...]                      # (BS, BS) block-diag + key-padding mask

    for l in range(LAYERS):
        # ---- fused QKV projection: one MXU push for a (BS, 3H) output ----
        qkv = jnp.dot(h.astype(MXU_DTYPE), wget(f"wqkv{l}"),
                      preferred_element_type=jnp.float32) + pget(f"bqkv{l}")

        # ---- multi-head attention with batch folded via block-diagonal mask ----
        ctx_heads = []
        for hd in range(HEADS):
            q = qkv[:, hd * HEAD_DIM:(hd + 1) * HEAD_DIM]
            k = qkv[:, HIDDEN + hd * HEAD_DIM:HIDDEN + (hd + 1) * HEAD_DIM]
            v = qkv[:, 2 * HIDDEN + hd * HEAD_DIM:2 * HIDDEN + (hd + 1) * HEAD_DIM]
            s = lax.dot_general(q.astype(MXU_DTYPE), k.astype(MXU_DTYPE),
                                (((1,), (1,)), ((), ())),
                                preferred_element_type=jnp.float32)   # (BS, BS)
            s = s * ATTN_SCALE + bias
            s = s - jnp.max(s, axis=-1, keepdims=True)
            p = jnp.exp(s)
            p = p * pl.reciprocal(jnp.sum(p, axis=-1, keepdims=True), approx=False)
            ctx_heads.append(jnp.dot(p.astype(MXU_DTYPE), v.astype(MXU_DTYPE),
                                     preferred_element_type=jnp.float32))  # (BS, Dh)
        ctx = jnp.concatenate(ctx_heads, axis=-1)                  # (BS, H), registers

        attn = jnp.dot(ctx.astype(MXU_DTYPE), wget(f"wo{l}"),
                       preferred_element_type=jnp.float32) + pget(f"bo{l}")
        h = _layernorm(h + attn, pget(f"ln1g{l}"), pget(f"ln1b{l}"))

        # ---- FFN: 64-wide intermediate never leaves the kernel ----
        ff = _gelu(jnp.dot(h.astype(MXU_DTYPE), wget(f"w1{l}"),
                           preferred_element_type=jnp.float32) + pget(f"b1{l}"))
        ff = jnp.dot(ff.astype(MXU_DTYPE), wget(f"w2{l}"),
                     preferred_element_type=jnp.float32) + pget(f"b2{l}")
        h = _layernorm(h + ff, pget(f"ln2g{l}"), pget(f"ln2b{l}"))

    o_ref[...] = h.astype(o_ref.dtype)


# ----------------------------- parameters (packed into 2 slabs) ------------------
def init_params(key):
    def nrm(k, shape):
        return 0.02 * jax.random.normal(k, shape, dtype=jnp.float32)

    keys = iter(jax.random.split(key, 32))
    word = nrm(next(keys), (VOCAB, HIDDEN))
    pos = nrm(next(keys), (MAX_POS, HIDDEN))
    segm = nrm(next(keys), (SEG_TYPES, HIDDEN))

    w_slab = np.zeros((W_ROWS, LANES), np.float32)
    p_slab = np.zeros((P_ROWS, LANES), np.float32)

    def wput(name, arr):
        arr = np.asarray(arr)
        r = W_OFF[name]
        w_slab[r:r + arr.shape[0], :arr.shape[1]] = arr

    def pput(name, arr):
        arr = np.asarray(arr)
        r = P_OFF[name]
        p_slab[r:r + arr.shape[0], :arr.shape[1]] = arr

    wput("wemb", word)
    semb = np.zeros((SEG_PAD, HIDDEN), np.float32)
    semb[:SEG_TYPES] = np.asarray(segm)
    wput("semb", semb)

    pput("pos", np.asarray(pos[:SEQ]))
    pput("emb_g", np.ones((1, HIDDEN), np.float32))
    pput("emb_b", np.zeros((1, HIDDEN), np.float32))

    for l in range(LAYERS):
        wq = np.asarray(nrm(next(keys), (HIDDEN, HIDDEN)))
        wk = np.asarray(nrm(next(keys), (HIDDEN, HIDDEN)))
        wv = np.asarray(nrm(next(keys), (HIDDEN, HIDDEN)))
        wo = np.asarray(nrm(next(keys), (HIDDEN, HIDDEN)))
        w1 = np.asarray(nrm(next(keys), (HIDDEN, FFN)))
        w2 = np.asarray(nrm(next(keys), (FFN, HIDDEN)))
        wput(f"wqkv{l}", np.concatenate([wq, wk, wv], axis=1))
        wput(f"wo{l}", wo)
        wput(f"w1{l}", w1)
        wput(f"w2{l}", w2)
        pput(f"bqkv{l}", np.zeros((1, 3 * HIDDEN), np.float32))
        pput(f"bo{l}", np.zeros((1, HIDDEN), np.float32))
        pput(f"ln1g{l}", np.ones((1, HIDDEN), np.float32))
        pput(f"ln1b{l}", np.zeros((1, HIDDEN), np.float32))
        pput(f"b1{l}", np.zeros((1, FFN), np.float32))
        pput(f"b2{l}", np.zeros((1, HIDDEN), np.float32))
        pput(f"ln2g{l}", np.ones((1, HIDDEN), np.float32))
        pput(f"ln2b{l}", np.zeros((1, HIDDEN), np.float32))

    return {
        "w_slab": jnp.asarray(w_slab).astype(MXU_DTYPE),   # (400, 128) bf16
        "p_slab": jnp.asarray(p_slab),                     # (152, 128) f32
    }


# ----------------------------- wrapper --------------------------------------------
def sequence_encoder(params, src, seg):
    B, S = src.shape
    assert (B, S) == (BATCH, SEQ)

    src_flat = src.reshape(B * S).astype(jnp.int32)
    seg_flat = seg.reshape(B * S).astype(jnp.int32)
    ids = jnp.stack([src_flat, seg_flat], axis=1)                  # (BS, 2)

    # Additive attention bias: block-diagonal over batch + key-padding (seg==0).
    row = jnp.arange(B * S)
    same_batch = (row[:, None] // S) == (row[None, :] // S)
    key_valid = (seg_flat > 0)[None, :]
    attn_bias = jnp.where(same_batch & key_valid,
                          jnp.float32(0.0), jnp.float32(NEG_INF))  # (BS, BS)

    vmem = pl.BlockSpec(memory_space=pltpu.MemorySpace.VMEM)
    out = pl.pallas_call(
        _encoder_kernel,
        out_shape=jax.ShapeDtypeStruct((B * S, HIDDEN), jnp.float32),
        in_specs=[vmem, vmem, vmem, vmem],
        out_specs=vmem,
    )(ids, attn_bias, params["w_slab"], params["p_slab"])

    return out.reshape(B, S, HIDDEN)


if __name__ == "__main__":
    key = jax.random.PRNGKey(0)
    pkey, skey = jax.random.split(key)
    params = init_params(pkey)

    src = jax.random.randint(skey, (BATCH, SEQ), minval=1, maxval=VOCAB, dtype=jnp.int32)
    seg = jnp.array([[1, 1, 1, 1, 1, 1, 0, 0],
                     [1, 1, 1, 1, 2, 2, 2, 0]], dtype=jnp.int32)

    out = sequence_encoder(params, src, seg)
    jax.block_until_ready(out)
    assert out.shape == (BATCH, SEQ, HIDDEN)
    assert bool(jnp.all(jnp.isfinite(out)))
    print("KERNEL_OK")
</pallas_src>

<mosaic_0001>
module attributes {stable_mosaic.version = 11 : i64} {
  func.func @_encoder_kernel(%arg0: memref<16x2xi32, #tpu.memory_space<vmem>>, %arg1: memref<16x16xf32, #tpu.memory_space<vmem>>, %arg2: memref<400x128xbf16, #tpu.memory_space<vmem>>, %arg3: memref<152x128xf32, #tpu.memory_space<vmem>>, %arg4: memref<16x32xf32, #tpu.memory_space<vmem>>) attributes {dimension_semantics = [], scalar_prefetch = 0 : i64, scratch_operands = 0 : i64, tpu.core_type = #tpu.core_type<tc>} {
    %c0 = arith.constant 0 : index
    %c0_0 = arith.constant 0 : index
    %0 = vector.load %arg0[%c0, %c0_0] : memref<16x2xi32, #tpu.memory_space<vmem>>, vector<16x2xi32>
    %1 = vector.extract_strided_slice %0 {offsets = [0, 0], sizes = [16, 1], strides = [1, 1]} : vector<16x2xi32> to vector<16x1xi32>
    %2 = vector.extract_strided_slice %0 {offsets = [0, 1], sizes = [16, 1], strides = [1, 1]} : vector<16x2xi32> to vector<16x1xi32>
    %3 = tpu.iota {dimensions = array<i32: 1>} : vector<16x64xi32>
    %4 = vector.broadcast %1 : vector<16x1xi32> to vector<16x64xi32>
    %5 = arith.cmpi eq, %3, %4 : vector<16x64xi32>
    %6 = arith.extui %5 : vector<16x64xi1> to vector<16x64xi32>
    %7 = arith.sitofp %6 : vector<16x64xi32> to vector<16x64xf32>
    %8 = arith.truncf %7 : vector<16x64xf32> to vector<16x64xbf16>
    %9 = tpu.iota {dimensions = array<i32: 1>} : vector<16x8xi32>
    %10 = vector.broadcast %2 : vector<16x1xi32> to vector<16x8xi32>
    %11 = arith.cmpi eq, %9, %10 : vector<16x8xi32>
    %12 = arith.extui %11 : vector<16x8xi1> to vector<16x8xi32>
    %13 = arith.sitofp %12 : vector<16x8xi32> to vector<16x8xf32>
    %14 = arith.truncf %13 : vector<16x8xf32> to vector<16x8xbf16>
    %c0_1 = arith.constant 0 : index
    %c0_2 = arith.constant 0 : index
    %15 = vector.load %arg2[%c0_1, %c0_2] : memref<400x128xbf16, #tpu.memory_space<vmem>>, vector<64x32xbf16>
    %cst = arith.constant dense<0.000000e+00> : vector<16x32xf32>
    %16 = tpu.matmul %8, %15, %cst {dimension_numbers = #tpu.dot_dimension_numbers<[1], [0], [0], [1], [0, 0, 1, 1], [], []>} : vector<16x64xbf16>, vector<64x32xbf16>, vector<16x32xf32> -> vector<16x32xf32>
    %c64 = arith.constant 64 : index
    %c0_3 = arith.constant 0 : index
    %17 = vector.load %arg2[%c64, %c0_3] : memref<400x128xbf16, #tpu.memory_space<vmem>>, vector<8x32xbf16>
    %cst_4 = arith.constant dense<0.000000e+00> : vector<16x32xf32>
    %18 = tpu.matmul %14, %17, %cst_4 {dimension_numbers = #tpu.dot_dimension_numbers<[1], [0], [0], [1], [0, 0, 1, 1], [], []>} : vector<16x8xbf16>, vector<8x32xbf16>, vector<16x32xf32> -> vector<16x32xf32>
    %19 = arith.addf %16, %18 : vector<16x32xf32>
    %c0_5 = arith.constant 0 : index
    %c0_6 = arith.constant 0 : index
    %20 = vector.load %arg3[%c0_5, %c0_6] : memref<152x128xf32, #tpu.memory_space<vmem>>, vector<8x32xf32>
    %21 = tpu.concatenate %20, %20 in 0 : vector<8x32xf32>, vector<8x32xf32> -> vector<16x32xf32>
    %22 = arith.addf %19, %21 : vector<16x32xf32>
    %c8 = arith.constant 8 : index
    %c0_7 = arith.constant 0 : index
    %23 = vector.load %arg3[%c8, %c0_7] : memref<152x128xf32, #tpu.memory_space<vmem>>, vector<1x32xf32>
    %c16 = arith.constant 16 : index
    %c0_8 = arith.constant 0 : index
    %24 = vector.load %arg3[%c16, %c0_8] : memref<152x128xf32, #tpu.memory_space<vmem>>, vector<1x32xf32>
    %cst_9 = arith.constant dense<0.000000e+00> : vector<16xf32>
    %25 = vector.multi_reduction <add>, %22, %cst_9 [1] : vector<16x32xf32> to vector<16xf32>
    %26 = vector.shape_cast %25 : vector<16xf32> to vector<16x1xf32>
    %cst_10 = arith.constant 3.200000e+01 : f32
    %27 = vector.broadcast %cst_10 : f32 to vector<16x1xf32>
    %28 = arith.divf %26, %27 : vector<16x1xf32>
    %29 = vector.broadcast %28 : vector<16x1xf32> to vector<16x32xf32>
    %30 = arith.subf %22, %29 : vector<16x32xf32>
    %31 = arith.mulf %30, %30 : vector<16x32xf32>
    %cst_11 = arith.constant dense<0.000000e+00> : vector<16xf32>
    %32 = vector.multi_reduction <add>, %31, %cst_11 [1] : vector<16x32xf32> to vector<16xf32>
    %33 = vector.shape_cast %32 : vector<16xf32> to vector<16x1xf32>
    %cst_12 = arith.constant 3.200000e+01 : f32
    %34 = vector.broadcast %cst_12 : f32 to vector<16x1xf32>
    %35 = arith.divf %33, %34 : vector<16x1xf32>
    %cst_13 = arith.constant 9.99999997E-7 : f32
    %36 = vector.broadcast %cst_13 : f32 to vector<16x1xf32>
    %37 = arith.addf %35, %36 : vector<16x1xf32>
    %38 = math.rsqrt %37 : vector<16x1xf32>
    %39 = vector.broadcast %38 : vector<16x1xf32> to vector<16x32xf32>
    %40 = arith.mulf %30, %39 : vector<16x32xf32>
    %41 = vector.broadcast %23 : vector<1x32xf32> to vector<16x32xf32>
    %42 = arith.mulf %40, %41 : vector<16x32xf32>
    %43 = vector.broadcast %24 : vector<1x32xf32> to vector<16x32xf32>
    %44 = arith.addf %42, %43 : vector<16x32xf32>
    %c0_14 = arith.constant 0 : index
    %c0_15 = arith.constant 0 : index
    %45 = vector.load %arg1[%c0_14, %c0_15] : memref<16x16xf32, #tpu.memory_space<vmem>>, vector<16x16xf32>
    %46 = arith.truncf %44 : vector<16x32xf32> to vector<16x32xbf16>
    %c80 = arith.constant 80 : index
    %c0_16 = arith.constant 0 : index
    %47 = vector.load %arg2[%c80, %c0_16] : memref<400x128xbf16, #tpu.memory_space<vmem>>, vector<32x96xbf16>
    %cst_17 = arith.constant dense<0.000000e+00> : vector<16x96xf32>
    %48 = tpu.matmul %46, %47, %cst_17 {dimension_numbers = #tpu.dot_dimension_numbers<[1], [0], [0], [1], [0, 0, 1, 1], [], []>} : vector<16x32xbf16>, vector<32x96xbf16>, vector<16x96xf32> -> vector<16x96xf32>
    %c24 = arith.constant 24 : index
    %c0_18 = arith.constant 0 : index
    %49 = vector.load %arg3[%c24, %c0_18] : memref<152x128xf32, #tpu.memory_space<vmem>>, vector<1x96xf32>
    %50 = vector.broadcast %49 : vector<1x96xf32> to vector<16x96xf32>
    %51 = arith.addf %48, %50 : vector<16x96xf32>
    %52 = vector.extract_strided_slice %51 {offsets = [0, 0], sizes = [16, 16], strides = [1, 1]} : vector<16x96xf32> to vector<16x16xf32>
    %53 = vector.extract_strided_slice %51 {offsets = [0, 32], sizes = [16, 16], strides = [1, 1]} : vector<16x96xf32> to vector<16x16xf32>
    %54 = vector.extract_strided_slice %51 {offsets = [0, 64], sizes = [16, 16], strides = [1, 1]} : vector<16x96xf32> to vector<16x16xf32>
    %55 = arith.truncf %52 : vector<16x16xf32> to vector<16x16xbf16>
    %56 = arith.truncf %53 : vector<16x16xf32> to vector<16x16xbf16>
    %cst_19 = arith.constant dense<0.000000e+00> : vector<16x16xf32>
    %57 = tpu.matmul %55, %56, %cst_19 {dimension_numbers = #tpu.dot_dimension_numbers<[1], [1], [0], [0], [0, 0, 1, 0], [], []>} : vector<16x16xbf16>, vector<16x16xbf16>, vector<16x16xf32> -> vector<16x16xf32>
    %cst_20 = arith.constant 2.500000e-01 : f32
    %58 = vector.broadcast %cst_20 : f32 to vector<16x16xf32>
    %59 = arith.mulf %57, %58 : vector<16x16xf32>
    %60 = arith.addf %59, %45 : vector<16x16xf32>
    %cst_21 = arith.constant dense<0xFF800000> : vector<16xf32>
    %61 = vector.multi_reduction <maximumf>, %60, %cst_21 [1] : vector<16x16xf32> to vector<16xf32>
    %62 = vector.shape_cast %61 : vector<16xf32> to vector<16x1xf32>
    %63 = vector.broadcast %62 : vector<16x1xf32> to vector<16x16xf32>
    %64 = arith.subf %60, %63 : vector<16x16xf32>
    %65 = math.exp %64 : vector<16x16xf32>
    %cst_22 = arith.constant dense<0.000000e+00> : vector<16xf32>
    %66 = vector.multi_reduction <add>, %65, %cst_22 [1] : vector<16x16xf32> to vector<16xf32>
    %67 = vector.shape_cast %66 : vector<16xf32> to vector<16x1xf32>
    %68 = tpu.reciprocal %67 : vector<16x1xf32> -> vector<16x1xf32>
    %69 = vector.broadcast %68 : vector<16x1xf32> to vector<16x16xf32>
    %70 = arith.mulf %65, %69 : vector<16x16xf32>
    %71 = arith.truncf %70 : vector<16x16xf32> to vector<16x16xbf16>
    %72 = arith.truncf %54 : vector<16x16xf32> to vector<16x16xbf16>
    %cst_23 = arith.constant dense<0.000000e+00> : vector<16x16xf32>
    %73 = tpu.matmul %71, %72, %cst_23 {dimension_numbers = #tpu.dot_dimension_numbers<[1], [0], [0], [1], [0, 0, 1, 1], [], []>} : vector<16x16xbf16>, vector<16x16xbf16>, vector<16x16xf32> -> vector<16x16xf32>
    %74 = vector.extract_strided_slice %51 {offsets = [0, 16], sizes = [16, 16], strides = [1, 1]} : vector<16x96xf32> to vector<16x16xf32>
    %75 = vector.extract_strided_slice %51 {offsets = [0, 48], sizes = [16, 16], strides = [1, 1]} : vector<16x96xf32> to vector<16x16xf32>
    %76 = vector.extract_strided_slice %51 {offsets = [0, 80], sizes = [16, 16], strides = [1, 1]} : vector<16x96xf32> to vector<16x16xf32>
    %77 = arith.truncf %74 : vector<16x16xf32> to vector<16x16xbf16>
    %78 = arith.truncf %75 : vector<16x16xf32> to vector<16x16xbf16>
    %cst_24 = arith.constant dense<0.000000e+00> : vector<16x16xf32>
    %79 = tpu.matmul %77, %78, %cst_24 {dimension_numbers = #tpu.dot_dimension_numbers<[1], [1], [0], [0], [0, 0, 1, 0], [], []>} : vector<16x16xbf16>, vector<16x16xbf16>, vector<16x16xf32> -> vector<16x16xf32>
    %cst_25 = arith.constant 2.500000e-01 : f32
    %80 = vector.broadcast %cst_25 : f32 to vector<16x16xf32>
    %81 = arith.mulf %79, %80 : vector<16x16xf32>
    %82 = arith.addf %81, %45 : vector<16x16xf32>
    %cst_26 = arith.constant dense<0xFF800000> : vector<16xf32>
    %83 = vector.multi_reduction <maximumf>, %82, %cst_26 [1] : vector<16x16xf32> to vector<16xf32>
    %84 = vector.shape_cast %83 : vector<16xf32> to vector<16x1xf32>
    %85 = vector.broadcast %84 : vector<16x1xf32> to vector<16x16xf32>
    %86 = arith.subf %82, %85 : vector<16x16xf32>
    %87 = math.exp %86 : vector<16x16xf32>
    %cst_27 = arith.constant dense<0.000000e+00> : vector<16xf32>
    %88 = vector.multi_reduction <add>, %87, %cst_27 [1] : vector<16x16xf32> to vector<16xf32>
    %89 = vector.shape_cast %88 : vector<16xf32> to vector<16x1xf32>
    %90 = tpu.reciprocal %89 : vector<16x1xf32> -> vector<16x1xf32>
    %91 = vector.broadcast %90 : vector<16x1xf32> to vector<16x16xf32>
    %92 = arith.mulf %87, %91 : vector<16x16xf32>
    %93 = arith.truncf %92 : vector<16x16xf32> to vector<16x16xbf16>
    %94 = arith.truncf %76 : vector<16x16xf32> to vector<16x16xbf16>
    %cst_28 = arith.constant dense<0.000000e+00> : vector<16x16xf32>
    %95 = tpu.matmul %93, %94, %cst_28 {dimension_numbers = #tpu.dot_dimension_numbers<[1], [0], [0], [1], [0, 0, 1, 1], [], []>} : vector<16x16xbf16>, vector<16x16xbf16>, vector<16x16xf32> -> vector<16x16xf32>
    %96 = tpu.concatenate %73, %95 in 1 : vector<16x16xf32>, vector<16x16xf32> -> vector<16x32xf32>
    %97 = arith.truncf %96 : vector<16x32xf32> to vector<16x32xbf16>
    %c112 = arith.constant 112 : index
    %c0_29 = arith.constant 0 : index
    %98 = vector.load %arg2[%c112, %c0_29] : memref<400x128xbf16, #tpu.memory_space<vmem>>, vector<32x32xbf16>
    %cst_30 = arith.constant dense<0.000000e+00> : vector<16x32xf32>
    %99 = tpu.matmul %97, %98, %cst_30 {dimension_numbers = #tpu.dot_dimension_numbers<[1], [0], [0], [1], [0, 0, 1, 1], [], []>} : vector<16x32xbf16>, vector<32x32xbf16>, vector<16x32xf32> -> vector<16x32xf32>
    %c32 = arith.constant 32 : index
    %c0_31 = arith.constant 0 : index
    %100 = vector.load %arg3[%c32, %c0_31] : memref<152x128xf32, #tpu.memory_space<vmem>>, vector<1x32xf32>
    %101 = vector.broadcast %100 : vector<1x32xf32> to vector<16x32xf32>
    %102 = arith.addf %99, %101 : vector<16x32xf32>
    %103 = arith.addf %44, %102 : vector<16x32xf32>
    %c40 = arith.constant 40 : index
    %c0_32 = arith.constant 0 : index
    %104 = vector.load %arg3[%c40, %c0_32] : memref<152x128xf32, #tpu.memory_space<vmem>>, vector<1x32xf32>
    %c48 = arith.constant 48 : index
    %c0_33 = arith.constant 0 : index
    %105 = vector.load %arg3[%c48, %c0_33] : memref<152x128xf32, #tpu.memory_space<vmem>>, vector<1x32xf32>
    %cst_34 = arith.constant dense<0.000000e+00> : vector<16xf32>
    %106 = vector.multi_reduction <add>, %103, %cst_34 [1] : vector<16x32xf32> to vector<16xf32>
    %107 = vector.shape_cast %106 : vector<16xf32> to vector<16x1xf32>
    %cst_35 = arith.constant 3.200000e+01 : f32
    %108 = vector.broadcast %cst_35 : f32 to vector<16x1xf32>
    %109 = arith.divf %107, %108 : vector<16x1xf32>
    %110 = vector.broadcast %109 : vector<16x1xf32> to vector<16x32xf32>
    %111 = arith.subf %103, %110 : vector<16x32xf32>
    %112 = arith.mulf %111, %111 : vector<16x32xf32>
    %cst_36 = arith.constant dense<0.000000e+00> : vector<16xf32>
    %113 = vector.multi_reduction <add>, %112, %cst_36 [1] : vector<16x32xf32> to vector<16xf32>
    %114 = vector.shape_cast %113 : vector<16xf32> to vector<16x1xf32>
    %cst_37 = arith.constant 3.200000e+01 : f32
    %115 = vector.broadcast %cst_37 : f32 to vector<16x1xf32>
    %116 = arith.divf %114, %115 : vector<16x1xf32>
    %cst_38 = arith.constant 9.99999997E-7 : f32
    %117 = vector.broadcast %cst_38 : f32 to vector<16x1xf32>
    %118 = arith.addf %116, %117 : vector<16x1xf32>
    %119 = math.rsqrt %118 : vector<16x1xf32>
    %120 = vector.broadcast %119 : vector<16x1xf32> to vector<16x32xf32>
    %121 = arith.mulf %111, %120 : vector<16x32xf32>
    %122 = vector.broadcast %104 : vector<1x32xf32> to vector<16x32xf32>
    %123 = arith.mulf %121, %122 : vector<16x32xf32>
    %124 = vector.broadcast %105 : vector<1x32xf32> to vector<16x32xf32>
    %125 = arith.addf %123, %124 : vector<16x32xf32>
    %126 = arith.truncf %125 : vector<16x32xf32> to vector<16x32xbf16>
    %c144 = arith.constant 144 : index
    %c0_39 = arith.constant 0 : index
    %127 = vector.load %arg2[%c144, %c0_39] : memref<400x128xbf16, #tpu.memory_space<vmem>>, vector<32x64xbf16>
    %cst_40 = arith.constant dense<0.000000e+00> : vector<16x64xf32>
    %128 = tpu.matmul %126, %127, %cst_40 {dimension_numbers = #tpu.dot_dimension_numbers<[1], [0], [0], [1], [0, 0, 1, 1], [], []>} : vector<16x32xbf16>, vector<32x64xbf16>, vector<16x64xf32> -> vector<16x64xf32>
    %c56 = arith.constant 56 : index
    %c0_41 = arith.constant 0 : index
    %129 = vector.load %arg3[%c56, %c0_41] : memref<152x128xf32, #tpu.memory_space<vmem>>, vector<1x64xf32>
    %130 = vector.broadcast %129 : vector<1x64xf32> to vector<16x64xf32>
    %131 = arith.addf %128, %130 : vector<16x64xf32>
    %cst_42 = arith.constant 5.000000e-01 : f32
    %132 = vector.broadcast %cst_42 : f32 to vector<16x64xf32>
    %133 = arith.mulf %132, %131 : vector<16x64xf32>
    %cst_43 = arith.constant 4.471500e-02 : f32
    %134 = vector.broadcast %cst_43 : f32 to vector<16x64xf32>
    %135 = arith.mulf %134, %131 : vector<16x64xf32>
    %136 = arith.mulf %135, %131 : vector<16x64xf32>
    %137 = arith.mulf %136, %131 : vector<16x64xf32>
    %138 = arith.addf %131, %137 : vector<16x64xf32>
    %cst_44 = arith.constant 0.797884583 : f32
    %139 = vector.broadcast %cst_44 : f32 to vector<16x64xf32>
    %140 = arith.mulf %139, %138 : vector<16x64xf32>
    %141 = math.tanh %140 : vector<16x64xf32>
    %cst_45 = arith.constant 1.000000e+00 : f32
    %142 = vector.broadcast %cst_45 : f32 to vector<16x64xf32>
    %143 = arith.addf %142, %141 : vector<16x64xf32>
    %144 = arith.mulf %133, %143 : vector<16x64xf32>
    %145 = arith.truncf %144 : vector<16x64xf32> to vector<16x64xbf16>
    %c176 = arith.constant 176 : index
    %c0_46 = arith.constant 0 : index
    %146 = vector.load %arg2[%c176, %c0_46] : memref<400x128xbf16, #tpu.memory_space<vmem>>, vector<64x32xbf16>
    %cst_47 = arith.constant dense<0.000000e+00> : vector<16x32xf32>
    %147 = tpu.matmul %145, %146, %cst_47 {dimension_numbers = #tpu.dot_dimension_numbers<[1], [0], [0], [1], [0, 0, 1, 1], [], []>} : vector<16x64xbf16>, vector<64x32xbf16>, vector<16x32xf32> -> vector<16x32xf32>
    %c64_48 = arith.constant 64 : index
    %c0_49 = arith.constant 0 : index
    %148 = vector.load %arg3[%c64_48, %c0_49] : memref<152x128xf32, #tpu.memory_space<vmem>>, vector<1x32xf32>
    %149 = vector.broadcast %148 : vector<1x32xf32> to vector<16x32xf32>
    %150 = arith.addf %147, %149 : vector<16x32xf32>
    %151 = arith.addf %125, %150 : vector<16x32xf32>
    %c72 = arith.constant 72 : index
    %c0_50 = arith.constant 0 : index
    %152 = vector.load %arg3[%c72, %c0_50] : memref<152x128xf32, #tpu.memory_space<vmem>>, vector<1x32xf32>
    %c80_51 = arith.constant 80 : index
    %c0_52 = arith.constant 0 : index
    %153 = vector.load %arg3[%c80_51, %c0_52] : memref<152x128xf32, #tpu.memory_space<vmem>>, vector<1x32xf32>
    %cst_53 = arith.constant dense<0.000000e+00> : vector<16xf32>
    %154 = vector.multi_reduction <add>, %151, %cst_53 [1] : vector<16x32xf32> to vector<16xf32>
    %155 = vector.shape_cast %154 : vector<16xf32> to vector<16x1xf32>
    %cst_54 = arith.constant 3.200000e+01 : f32
    %156 = vector.broadcast %cst_54 : f32 to vector<16x1xf32>
    %157 = arith.divf %155, %156 : vector<16x1xf32>
    %158 = vector.broadcast %157 : vector<16x1xf32> to vector<16x32xf32>
    %159 = arith.subf %151, %158 : vector<16x32xf32>
    %160 = arith.mulf %159, %159 : vector<16x32xf32>
    %cst_55 = arith.constant dense<0.000000e+00> : vector<16xf32>
    %161 = vector.multi_reduction <add>, %160, %cst_55 [1] : vector<16x32xf32> to vector<16xf32>
    %162 = vector.shape_cast %161 : vector<16xf32> to vector<16x1xf32>
    %cst_56 = arith.constant 3.200000e+01 : f32
    %163 = vector.broadcast %cst_56 : f32 to vector<16x1xf32>
    %164 = arith.divf %162, %163 : vector<16x1xf32>
    %cst_57 = arith.constant 9.99999997E-7 : f32
    %165 = vector.broadcast %cst_57 : f32 to vector<16x1xf32>
    %166 = arith.addf %164, %165 : vector<16x1xf32>
    %167 = math.rsqrt %166 : vector<16x1xf32>
    %168 = vector.broadcast %167 : vector<16x1xf32> to vector<16x32xf32>
    %169 = arith.mulf %159, %168 : vector<16x32xf32>
    %170 = vector.broadcast %152 : vector<1x32xf32> to vector<16x32xf32>
    %171 = arith.mulf %169, %170 : vector<16x32xf32>
    %172 = vector.broadcast %153 : vector<1x32xf32> to vector<16x32xf32>
    %173 = arith.addf %171, %172 : vector<16x32xf32>
    %174 = arith.truncf %173 : vector<16x32xf32> to vector<16x32xbf16>
    %c240 = arith.constant 240 : index
    %c0_58 = arith.constant 0 : index
    %175 = vector.load %arg2[%c240, %c0_58] : memref<400x128xbf16, #tpu.memory_space<vmem>>, vector<32x96xbf16>
    %cst_59 = arith.constant dense<0.000000e+00> : vector<16x96xf32>
    %176 = tpu.matmul %174, %175, %cst_59 {dimension_numbers = #tpu.dot_dimension_numbers<[1], [0], [0], [1], [0, 0, 1, 1], [], []>} : vector<16x32xbf16>, vector<32x96xbf16>, vector<16x96xf32> -> vector<16x96xf32>
    %c88 = arith.constant 88 : index
    %c0_60 = arith.constant 0 : index
    %177 = vector.load %arg3[%c88, %c0_60] : memref<152x128xf32, #tpu.memory_space<vmem>>, vector<1x96xf32>
    %178 = vector.broadcast %177 : vector<1x96xf32> to vector<16x96xf32>
    %179 = arith.addf %176, %178 : vector<16x96xf32>
    %180 = vector.extract_strided_slice %179 {offsets = [0, 0], sizes = [16, 16], strides = [1, 1]} : vector<16x96xf32> to vector<16x16xf32>
    %181 = vector.extract_strided_slice %179 {offsets = [0, 32], sizes = [16, 16], strides = [1, 1]} : vector<16x96xf32> to vector<16x16xf32>
    %182 = vector.extract_strided_slice %179 {offsets = [0, 64], sizes = [16, 16], strides = [1, 1]} : vector<16x96xf32> to vector<16x16xf32>
    %183 = arith.truncf %180 : vector<16x16xf32> to vector<16x16xbf16>
    %184 = arith.truncf %181 : vector<16x16xf32> to vector<16x16xbf16>
    %cst_61 = arith.constant dense<0.000000e+00> : vector<16x16xf32>
    %185 = tpu.matmul %183, %184, %cst_61 {dimension_numbers = #tpu.dot_dimension_numbers<[1], [1], [0], [0], [0, 0, 1, 0], [], []>} : vector<16x16xbf16>, vector<16x16xbf16>, vector<16x16xf32> -> vector<16x16xf32>
    %cst_62 = arith.constant 2.500000e-01 : f32
    %186 = vector.broadcast %cst_62 : f32 to vector<16x16xf32>
    %187 = arith.mulf %185, %186 : vector<16x16xf32>
    %188 = arith.addf %187, %45 : vector<16x16xf32>
    %cst_63 = arith.constant dense<0xFF800000> : vector<16xf32>
    %189 = vector.multi_reduction <maximumf>, %188, %cst_63 [1] : vector<16x16xf32> to vector<16xf32>
    %190 = vector.shape_cast %189 : vector<16xf32> to vector<16x1xf32>
    %191 = vector.broadcast %190 : vector<16x1xf32> to vector<16x16xf32>
    %192 = arith.subf %188, %191 : vector<16x16xf32>
    %193 = math.exp %192 : vector<16x16xf32>
    %cst_64 = arith.constant dense<0.000000e+00> : vector<16xf32>
    %194 = vector.multi_reduction <add>, %193, %cst_64 [1] : vector<16x16xf32> to vector<16xf32>
    %195 = vector.shape_cast %194 : vector<16xf32> to vector<16x1xf32>
    %196 = tpu.reciprocal %195 : vector<16x1xf32> -> vector<16x1xf32>
    %197 = vector.broadcast %196 : vector<16x1xf32> to vector<16x16xf32>
    %198 = arith.mulf %193, %197 : vector<16x16xf32>
    %199 = arith.truncf %198 : vector<16x16xf32> to vector<16x16xbf16>
    %200 = arith.truncf %182 : vector<16x16xf32> to vector<16x16xbf16>
    %cst_65 = arith.constant dense<0.000000e+00> : vector<16x16xf32>
    %201 = tpu.matmul %199, %200, %cst_65 {dimension_numbers = #tpu.dot_dimension_numbers<[1], [0], [0], [1], [0, 0, 1, 1], [], []>} : vector<16x16xbf16>, vector<16x16xbf16>, vector<16x16xf32> -> vector<16x16xf32>
    %202 = vector.extract_strided_slice %179 {offsets = [0, 16], sizes = [16, 16], strides = [1, 1]} : vector<16x96xf32> to vector<16x16xf32>
    %203 = vector.extract_strided_slice %179 {offsets = [0, 48], sizes = [16, 16], strides = [1, 1]} : vector<16x96xf32> to vector<16x16xf32>
    %204 = vector.extract_strided_slice %179 {offsets = [0, 80], sizes = [16, 16], strides = [1, 1]} : vector<16x96xf32> to vector<16x16xf32>
    %205 = arith.truncf %202 : vector<16x16xf32> to vector<16x16xbf16>
    %206 = arith.truncf %203 : vector<16x16xf32> to vector<16x16xbf16>
    %cst_66 = arith.constant dense<0.000000e+00> : vector<16x16xf32>
    %207 = tpu.matmul %205, %206, %cst_66 {dimension_numbers = #tpu.dot_dimension_numbers<[1], [1], [0], [0], [0, 0, 1, 0], [], []>} : vector<16x16xbf16>, vector<16x16xbf16>, vector<16x16xf32> -> vector<16x16xf32>
    %cst_67 = arith.constant 2.500000e-01 : f32
    %208 = vector.broadcast %cst_67 : f32 to vector<16x16xf32>
    %209 = arith.mulf %207, %208 : vector<16x16xf32>
    %210 = arith.addf %209, %45 : vector<16x16xf32>
    %cst_68 = arith.constant dense<0xFF800000> : vector<16xf32>
    %211 = vector.multi_reduction <maximumf>, %210, %cst_68 [1] : vector<16x16xf32> to vector<16xf32>
    %212 = vector.shape_cast %211 : vector<16xf32> to vector<16x1xf32>
    %213 = vector.broadcast %212 : vector<16x1xf32> to vector<16x16xf32>
    %214 = arith.subf %210, %213 : vector<16x16xf32>
    %215 = math.exp %214 : vector<16x16xf32>
    %cst_69 = arith.constant dense<0.000000e+00> : vector<16xf32>
    %216 = vector.multi_reduction <add>, %215, %cst_69 [1] : vector<16x16xf32> to vector<16xf32>
    %217 = vector.shape_cast %216 : vector<16xf32> to vector<16x1xf32>
    %218 = tpu.reciprocal %217 : vector<16x1xf32> -> vector<16x1xf32>
    %219 = vector.broadcast %218 : vector<16x1xf32> to vector<16x16xf32>
    %220 = arith.mulf %215, %219 : vector<16x16xf32>
    %221 = arith.truncf %220 : vector<16x16xf32> to vector<16x16xbf16>
    %222 = arith.truncf %204 : vector<16x16xf32> to vector<16x16xbf16>
    %cst_70 = arith.constant dense<0.000000e+00> : vector<16x16xf32>
    %223 = tpu.matmul %221, %222, %cst_70 {dimension_numbers = #tpu.dot_dimension_numbers<[1], [0], [0], [1], [0, 0, 1, 1], [], []>} : vector<16x16xbf16>, vector<16x16xbf16>, vector<16x16xf32> -> vector<16x16xf32>
    %224 = tpu.concatenate %201, %223 in 1 : vector<16x16xf32>, vector<16x16xf32> -> vector<16x32xf32>
    %225 = arith.truncf %224 : vector<16x32xf32> to vector<16x32xbf16>
    %c272 = arith.constant 272 : index
    %c0_71 = arith.constant 0 : index
    %226 = vector.load %arg2[%c272, %c0_71] : memref<400x128xbf16, #tpu.memory_space<vmem>>, vector<32x32xbf16>
    %cst_72 = arith.constant dense<0.000000e+00> : vector<16x32xf32>
    %227 = tpu.matmul %225, %226, %cst_72 {dimension_numbers = #tpu.dot_dimension_numbers<[1], [0], [0], [1], [0, 0, 1, 1], [], []>} : vector<16x32xbf16>, vector<32x32xbf16>, vector<16x32xf32> -> vector<16x32xf32>
    %c96 = arith.constant 96 : index
    %c0_73 = arith.constant 0 : index
    %228 = vector.load %arg3[%c96, %c0_73] : memref<152x128xf32, #tpu.memory_space<vmem>>, vector<1x32xf32>
    %229 = vector.broadcast %228 : vector<1x32xf32> to vector<16x32xf32>
    %230 = arith.addf %227, %229 : vector<16x32xf32>
    %231 = arith.addf %173, %230 : vector<16x32xf32>
    %c104 = arith.constant 104 : index
    %c0_74 = arith.constant 0 : index
    %232 = vector.load %arg3[%c104, %c0_74] : memref<152x128xf32, #tpu.memory_space<vmem>>, vector<1x32xf32>
    %c112_75 = arith.constant 112 : index
    %c0_76 = arith.constant 0 : index
    %233 = vector.load %arg3[%c112_75, %c0_76] : memref<152x128xf32, #tpu.memory_space<vmem>>, vector<1x32xf32>
    %cst_77 = arith.constant dense<0.000000e+00> : vector<16xf32>
    %234 = vector.multi_reduction <add>, %231, %cst_77 [1] : vector<16x32xf32> to vector<16xf32>
    %235 = vector.shape_cast %234 : vector<16xf32> to vector<16x1xf32>
    %cst_78 = arith.constant 3.200000e+01 : f32
    %236 = vector.broadcast %cst_78 : f32 to vector<16x1xf32>
    %237 = arith.divf %235, %236 : vector<16x1xf32>
    %238 = vector.broadcast %237 : vector<16x1xf32> to vector<16x32xf32>
    %239 = arith.subf %231, %238 : vector<16x32xf32>
    %240 = arith.mulf %239, %239 : vector<16x32xf32>
    %cst_79 = arith.constant dense<0.000000e+00> : vector<16xf32>
    %241 = vector.multi_reduction <add>, %240, %cst_79 [1] : vector<16x32xf32> to vector<16xf32>
    %242 = vector.shape_cast %241 : vector<16xf32> to vector<16x1xf32>
    %cst_80 = arith.constant 3.200000e+01 : f32
    %243 = vector.broadcast %cst_80 : f32 to vector<16x1xf32>
    %244 = arith.divf %242, %243 : vector<16x1xf32>
    %cst_81 = arith.constant 9.99999997E-7 : f32
    %245 = vector.broadcast %cst_81 : f32 to vector<16x1xf32>
    %246 = arith.addf %244, %245 : vector<16x1xf32>
    %247 = math.rsqrt %246 : vector<16x1xf32>
    %248 = vector.broadcast %247 : vector<16x1xf32> to vector<16x32xf32>
    %249 = arith.mulf %239, %248 : vector<16x32xf32>
    %250 = vector.broadcast %232 : vector<1x32xf32> to vector<16x32xf32>
    %251 = arith.mulf %249, %250 : vector<16x32xf32>
    %252 = vector.broadcast %233 : vector<1x32xf32> to vector<16x32xf32>
    %253 = arith.addf %251, %252 : vector<16x32xf32>
    %254 = arith.truncf %253 : vector<16x32xf32> to vector<16x32xbf16>
    %c304 = arith.constant 304 : index
    %c0_82 = arith.constant 0 : index
    %255 = vector.load %arg2[%c304, %c0_82] : memref<400x128xbf16, #tpu.memory_space<vmem>>, vector<32x64xbf16>
    %cst_83 = arith.constant dense<0.000000e+00> : vector<16x64xf32>
    %256 = tpu.matmul %254, %255, %cst_83 {dimension_numbers = #tpu.dot_dimension_numbers<[1], [0], [0], [1], [0, 0, 1, 1], [], []>} : vector<16x32xbf16>, vector<32x64xbf16>, vector<16x64xf32> -> vector<16x64xf32>
    %c120 = arith.constant 120 : index
    %c0_84 = arith.constant 0 : index
    %257 = vector.load %arg3[%c120, %c0_84] : memref<152x128xf32, #tpu.memory_space<vmem>>, vector<1x64xf32>
    %258 = vector.broadcast %257 : vector<1x64xf32> to vector<16x64xf32>
    %259 = arith.addf %256, %258 : vector<16x64xf32>
    %cst_85 = arith.constant 5.000000e-01 : f32
    %260 = vector.broadcast %cst_85 : f32 to vector<16x64xf32>
    %261 = arith.mulf %260, %259 : vector<16x64xf32>
    %cst_86 = arith.constant 4.471500e-02 : f32
    %262 = vector.broadcast %cst_86 : f32 to vector<16x64xf32>
    %263 = arith.mulf %262, %259 : vector<16x64xf32>
    %264 = arith.mulf %263, %259 : vector<16x64xf32>
    %265 = arith.mulf %264, %259 : vector<16x64xf32>
    %266 = arith.addf %259, %265 : vector<16x64xf32>
    %cst_87 = arith.constant 0.797884583 : f32
    %267 = vector.broadcast %cst_87 : f32 to vector<16x64xf32>
    %268 = arith.mulf %267, %266 : vector<16x64xf32>
    %269 = math.tanh %268 : vector<16x64xf32>
    %cst_88 = arith.constant 1.000000e+00 : f32
    %270 = vector.broadcast %cst_88 : f32 to vector<16x64xf32>
    %271 = arith.addf %270, %269 : vector<16x64xf32>
    %272 = arith.mulf %261, %271 : vector<16x64xf32>
    %273 = arith.truncf %272 : vector<16x64xf32> to vector<16x64xbf16>
    %c336 = arith.constant 336 : index
    %c0_89 = arith.constant 0 : index
    %274 = vector.load %arg2[%c336, %c0_89] : memref<400x128xbf16, #tpu.memory_space<vmem>>, vector<64x32xbf16>
    %cst_90 = arith.constant dense<0.000000e+00> : vector<16x32xf32>
    %275 = tpu.matmul %273, %274, %cst_90 {dimension_numbers = #tpu.dot_dimension_numbers<[1], [0], [0], [1], [0, 0, 1, 1], [], []>} : vector<16x64xbf16>, vector<64x32xbf16>, vector<16x32xf32> -> vector<16x32xf32>
    %c128 = arith.constant 128 : index
    %c0_91 = arith.constant 0 : index
    %276 = vector.load %arg3[%c128, %c0_91] : memref<152x128xf32, #tpu.memory_space<vmem>>, vector<1x32xf32>
    %277 = vector.broadcast %276 : vector<1x32xf32> to vector<16x32xf32>
    %278 = arith.addf %275, %277 : vector<16x32xf32>
    %279 = arith.addf %253, %278 : vector<16x32xf32>
    %c136 = arith.constant 136 : index
    %c0_92 = arith.constant 0 : index
    %280 = vector.load %arg3[%c136, %c0_92] : memref<152x128xf32, #tpu.memory_space<vmem>>, vector<1x32xf32>
    %c144_93 = arith.constant 144 : index
    %c0_94 = arith.constant 0 : index
    %281 = vector.load %arg3[%c144_93, %c0_94] : memref<152x128xf32, #tpu.memory_space<vmem>>, vector<1x32xf32>
    %cst_95 = arith.constant dense<0.000000e+00> : vector<16xf32>
    %282 = vector.multi_reduction <add>, %279, %cst_95 [1] : vector<16x32xf32> to vector<16xf32>
    %283 = vector.shape_cast %282 : vector<16xf32> to vector<16x1xf32>
    %cst_96 = arith.constant 3.200000e+01 : f32
    %284 = vector.broadcast %cst_96 : f32 to vector<16x1xf32>
    %285 = arith.divf %283, %284 : vector<16x1xf32>
    %286 = vector.broadcast %285 : vector<16x1xf32> to vector<16x32xf32>
    %287 = arith.subf %279, %286 : vector<16x32xf32>
    %288 = arith.mulf %287, %287 : vector<16x32xf32>
    %cst_97 = arith.constant dense<0.000000e+00> : vector<16xf32>
    %289 = vector.multi_reduction <add>, %288, %cst_97 [1] : vector<16x32xf32> to vector<16xf32>
    %290 = vector.shape_cast %289 : vector<16xf32> to vector<16x1xf32>
    %cst_98 = arith.constant 3.200000e+01 : f32
    %291 = vector.broadcast %cst_98 : f32 to vector<16x1xf32>
    %292 = arith.divf %290, %291 : vector<16x1xf32>
    %cst_99 = arith.constant 9.99999997E-7 : f32
    %293 = vector.broadcast %cst_99 : f32 to vector<16x1xf32>
    %294 = arith.addf %292, %293 : vector<16x1xf32>
    %295 = math.rsqrt %294 : vector<16x1xf32>
    %296 = vector.broadcast %295 : vector<16x1xf32> to vector<16x32xf32>
    %297 = arith.mulf %287, %296 : vector<16x32xf32>
    %298 = vector.broadcast %280 : vector<1x32xf32> to vector<16x32xf32>
    %299 = arith.mulf %297, %298 : vector<16x32xf32>
    %300 = vector.broadcast %281 : vector<1x32xf32> to vector<16x32xf32>
    %301 = arith.addf %299, %300 : vector<16x32xf32>
    %c0_100 = arith.constant 0 : index
    %c0_101 = arith.constant 0 : index
    %302 = vector.load %arg4[%c0_100, %c0_101] : memref<16x32xf32, #tpu.memory_space<vmem>>, vector<16x32xf32>
    tpu.vector_store %arg4[%c0_100, %c0_101], %301 {strides = array<i32>} : memref<16x32xf32, #tpu.memory_space<vmem>>, vector<16x32xf32>,
    return
  }
}

</mosaic_0001>

<bundles_post_ra>
// kernel: tpu_custom_call.1
= control target key start
LH: loop header
LB: loop body
LE: loop exit
PB: predicated region body
PF: predicated region fallthrough
CT: control target
= control target key end

     0   :  { %9 = vsyncpa [#allocation3], 0  ;;  %s2286_s0 = inlined_call_operand.vmem [shape: s32[16,2], index: 0, kind: input, shape index: {}]   ;;  %s2287_s1 = inlined_call_operand.vmem [shape: f32[16,16], index: 1, kind: input, shape index: {}]   ;;  %s2288_s2 = inlined_call_operand.hbm [shape: bf16[400,128], index: 2, kind: input, shape index: {}]   ;;  %s2289_s3 = inlined_call_operand.hbm [shape: f32[152,128], index: 3, kind: input, shape index: {}]   ;;  %s2290_s4 = inlined_call_operand.hbm [shape: f32[16,32], index: 4, kind: output, shape index: {}]  }
   0x1   :  { %10 = vsyncpa [#allocation6], 0 }
   0x2   :  { %11 = vsyncpa [#allocation4], 0  ;;  %s1994_s15 = smov [#allocation2]   ;;  %s1922_s19 = scalar_lea.hbm %s2288_s2, 3200 }
   0x3   :  { %s21_s16 = sshll.u32 %s1994_s15, 4  ;;  %p1923_p0 = scmp.ne.s32.totalorder %s2288_s2, %s1922_s19  ;;  %s22_s16 = int_to_ptr.vmem [resolvable:$true] %s21_s16 }
   0x4   :  { %p1926_p1 = scmp.lt.u32.totalorder %s1922_s19, %s2288_s2 }
   0x6   :  { %p1928_p2 = pnand %p1926_p1, %p1923_p0 }
   0x8   :  { %1931 = shalt.err (!%p1928_p2)
}
   0x9   :  { %s1932_s24 = scalar_lea.vmem %s22_s16, 3200  ;;  %p1937_p4 = scmp.lt.s32.totalorder %s22_s16, %s22_s16 }
   0xa   :  { %p1933_p3 = scmp.ne.s32.totalorder %s22_s16, %s1932_s24  ;;  %p1938_p5 = scmp.lt.s32.totalorder %s1932_s24, %s1932_s24 }
   0xc   :  { %p1939_p6 = por %p1938_p5, %p1937_p4 }
   0xe   :  { %p1940_p7 = pnand %p1939_p6, %p1933_p3 }
  0x10   :  { %1943 = shalt.err (!%p1940_p7)
}
  0x11   :  { %s1995_s25 = smov 64   ;;  %s1996_s26 = smov 4  }
  0x12   :  { %27 = dma.hbm_to_vmem [thread:$0]  %s2288_s2, 3200, %s22_s16, [#allocation3], %s1995_s25, %s1995_s25, %s1996_s26  }
  0x13   :  { %s1997_s29 = smov [#allocation5]   ;;  %s1944_s7 = scalar_lea.hbm %s2289_s3, 2432 }
  0x14   :  { %s33_s30 = sshll.u32 %s1997_s29, 4  ;;  %p1945_p8 = scmp.ne.s32.totalorder %s2289_s3, %s1944_s7  ;;  %s34_s30 = int_to_ptr.vmem [resolvable:$true] %s33_s30 }
  0x15   :  { %p1948_p9 = scmp.lt.u32.totalorder %s1944_s7, %s2289_s3 }
  0x17   :  { %p1950_p10 = pnand %p1948_p9, %p1945_p8 }
  0x19   :  { %1953 = shalt.err (!%p1950_p10)
}
  0x1a   :  { %s1954_s12 = scalar_lea.vmem %s34_s30, 2432  ;;  %p1959_p12 = scmp.lt.s32.totalorder %s34_s30, %s34_s30 }
  0x1b   :  { %p1955_p11 = scmp.ne.s32.totalorder %s34_s30, %s1954_s12  ;;  %p1960_p13 = scmp.lt.s32.totalorder %s1954_s12, %s1954_s12 }
  0x1d   :  { %p1961_p0 = por %p1960_p13, %p1959_p12 }
  0x1f   :  { %p1962_p1 = pnand %p1961_p0, %p1955_p11 }
  0x21   :  { %1965 = shalt.err (!%p1962_p1)
}
  0x22   :  { %s1998_s2 = smov 128   ;;  %s1999_s13 = smov 8  }
  0x23   :  { %39 = dma.hbm_to_vmem [thread:$0]  %s2289_s3, 2432, %s34_s30, [#allocation6], %s1998_s2, %s1998_s2, %s1999_s13  }
  0x24   :  { %1988 = dma.done.wait [#allocation3], 3200  }
  0x25   :  { %1989 = vsyncadd [#allocation3], 4294964096 }
  0x26   :  { %1990 = dma.done.wait [#allocation6], 2432  }
  0x27   :  { %1991 = vsyncadd [#allocation6], 4294964864  ;;  %v2000_v0 = vmov 1   ;;  %v2001_v1 = vmov 0   ;;  %v2002_v2 = vmov 0.0   ;;  %v47_v3 = vld [vmem:[%s2286_s0] sm:$0xff]  ;;  %v49_v11 = vlaneseq }
  0x28   :  { %1826 = vset.pattern.permute.xlu1 %v2000_v0  ;;  %1825 = vset.pattern.permute.xlu0 %v2001_v1  ;;  %v1838_v4 = vld [vmem:[#allocation2] sm:$0xff]   ;;  %v48_v5 = vld [vmem:[%s2286_s0 + $0x8] sm:$0xff]  ;;  %vm90_vm0 = vcmask 1043456   ;;  %v1840_v9 = vld [vmem:[#allocation2 + $0x10] sm:$0xff]   ;;  %vm2003_vm1 = vmmov 0   ;;  %vm86_vm6 = vcmask 64512  }
  0x29   :  { %1677 = vmatprep.subr.bf16.mxu1 %v2002_v2  ;;  %1671 = vmatprep.subr.bf16.mxu0 %v2002_v2  ;;  %v1839_v6 = vld [vmem:[#allocation2 + $0x8] sm:$0xff]   ;;  %v85_v7 = vld [vmem:[#allocation2 + $0x20] sm:$0xf]  ;;  %v1841_v10 = vld [vmem:[#allocation2 + $0x18] sm:$0xff]   ;;  %v50_v12 = vand.u32 127, %v49_v11  ;;  %vm159_vm7 = vcmask 523264  }
  0x2a   :  { %65 = vperm.xlu1 %1826, %v47_v3   ;;  %52 = vperm.xlu0 %1825, %v47_v3   ;;  %v92_v8 = vsel %vm90_vm0, %v85_v7, 0  ;;  %v204_v25 = vld [vmem:[#allocation5] sm:$0xff]  ;;  %vm209_vm8 = vcmask 261120   ;;  %v1843_v49 = vld [vmem:[#allocation2 + $0x30] sm:$0xff]   ;;  %v1567_v62 = vld [vmem:[#allocation5 + $0x10] ss:$0 sm:$0xff] }
  0x2b   :  { %1678 = vmatpush3.bf16.msra.mxu1 %v1838_v4  ;;  %1672 = vmatpush3.bf16.msra.mxu0 %v92_v8  ;;  %v1842_v48 = vld [vmem:[#allocation2 + $0x28] sm:$0xff]   ;;  %v1566_v58 = vld [vmem:[#allocation5 + $0x8] ss:$0 sm:$0xff]  ;;  %v1568_v4 = vld [vmem:[#allocation5 + $0x18] ss:$0 sm:$0xff]  ;;  %s2004_s0 = smov 96  }
  0x2c   :  { %1679 = vmatprep.subr.bf16.mxu1 %v2002_v2  ;;  %1689 = vmatprep.subr.bf16.mxu0 %v2002_v2  ;;  %s2005_s19 = smov 112   ;;  %vm321_vm9 = vcmask 130048   ;;  %s2007_s24 = smov 48  }
  0x2d   :  { %1673 = vmatprep.mubr.msk.bf16.mxu0 %vm2003_vm1, %v2002_v2  ;;  %1685 = vmatprep.mubr.msk.bf16.mxu1 %vm2003_vm1, %v2002_v2  ;;  %s2008_s26 = smov 16  }
  0x2e   :  { %68 = vperm.xlu1 %1826, %v48_v5   ;;  %55 = vperm.xlu0 %1825, %v48_v5  }
  0x2f   :  { %1680 = vmatpush3.bf16.msra.mxu1 %v1839_v6 }
  0x30   :  { %1681 = vmatprep.subr.bf16.mxu1 %v2002_v2 }
  0x32   :  { %1837 = vset.pattern.permute.xlu0 %v2000_v0 }
  0x33   :  { %1682 = vmatpush3.bf16.msra.mxu1 %v1840_v9 }
  0x34   :  { %1683 = vmatprep.subr.bf16.mxu1 %v2002_v2 }
  0x37   :  { %1684 = vmatpush3.bf16.msra.mxu1 %v1841_v10 }
  0x38   :  { %1715 = vmatprep.subr.bf16.mxu1 %v2002_v2 }
  0xa9   :  { %v66_v13 = vpop.permute.xlu1 %65  ;;  %v53_v14 = vpop.permute.xlu0 %52 }
  0xaa   :  { %vm70_vm2 = vcmp.eq.s32.totalorder %v50_v12, %v66_v13  ;;  %vm57_vm3 = vcmp.eq.s32.totalorder %v50_v12, %v53_v14 }
  0xab   :  { %v1558_v17 = vsel %vm70_vm2, 1.0, %v2002_v2  ;;  %v1556_v18 = vsel %vm57_vm3, 1.0, %v2002_v2 }
  0xad   :  { %v69_v15 = vpop.permute.xlu1 %68  ;;  %v56_v16 = vpop.permute.xlu0 %55 }
  0xae   :  { %vm71_vm4 = vcmp.eq.s32.totalorder %v50_v12, %v69_v15  ;;  %vm58_vm5 = vcmp.eq.s32.totalorder %v50_v12, %v56_v16  ;;  %v2123_v16 = vld [vmem:[%s2287_s1] sm:$0xff] }
  0xaf   :  { %v1559_v19 = vsel %vm71_vm4, 1.0, %v2002_v2  ;;  %v1557_v20 = vsel %vm58_vm5, 1.0, %v2002_v2 }
  0xb0   :  { %v76_v21 = vpack.c.bf16 %v1559_v19, %v1558_v17  ;;  %v63_v22 = vpack.c.bf16 %v1557_v20, %v1556_v18  ;;  %v2128_v20 = vld [vmem:[%s2287_s1 + $0x8] sm:$0xff]  ;;  %s2006_s1 = smov 80  }
  0xb2   :  { %1674 = vmatmul.mubr.msk.bf16.vlgmr.msra.gmra.mrb[0].mxu0 %vm86_vm6, %v76_v21  ;;  %1686 = vmatmul.mubr.msk.bf16.vlgmr.msra.gmra.mrb[0].mxu1 %vm159_vm7, %v63_v22 }
  0xb3   :  { %1693 = vmatprep.mubr.msk.bf16.mxu0 %vm2003_vm1, %v2002_v2  ;;  %1717 = vmatprep.mubr.msk.bf16.mxu1 %vm2003_vm1, %v2002_v2 }
  0xb4   :  { %1690 = vmatpush3.bf16.msra.mxu0 %v1842_v48 }
  0xb5   :  { %1691 = vmatprep.subr.bf16.mxu0 %v2002_v2 }
  0xb8   :  { %1692 = vmatpush3.bf16.msra.mxu0 %v1843_v49 }
  0xb9   :  { %1697 = vmatprep.subr.bf16.mxu0 %v2002_v2 }
 0x185   :  { %v128_v23 = vpop.f32.mrb[0].mxu0  ;;  %v197_v24 = vpop.f32.mrb[0].mxu1 }
 0x186   :  { %v198_v26 = vadd.f32 %v197_v24, %v128_v23  ;;  %v1675_v27 = vpop.f32.mrb[1].mxu0  ;;  %v1687_v28 = vpop.f32.mrb[1].mxu1 }
 0x187   :  { %v131_v29 = vpop.f32.mrb[2].mxu0  ;;  %v200_v30 = vpop.f32.mrb[2].mxu1 }
 0x188   :  { %v201_v31 = vadd.f32 %v200_v30, %v131_v29  ;;  %v1676_v32 = vpop.f32.mrb[3].mxu0  ;;  %v1688_v33 = vpop.f32.mrb[3].mxu1  ;;  %v205_v34 = vadd.f32 %v204_v25, %v198_v26 }
 0x18a   :  { %v210_v35 = vsel %vm209_vm8, %v205_v34, 0.0  ;;  %v206_v36 = vadd.f32 %v204_v25, %v201_v31 }
 0x18b   :  { %211 = vadd.xlane.f32.xlu0 %v210_v35 }
 0x18c   :  { %v213_v37 = vsel %vm209_vm8, %v206_v36, 0.0 }
 0x18d   :  { %214 = vadd.xlane.f32.xlu1 %v213_v37 }
 0x218   :  { %v212_v38 = vpop.xlane.xlu0 %211 }
 0x219   :  { %v217_v39 = vmul.f32 0.03125, %v212_v38 }
 0x21a   :  { %v215_v40 = vpop.xlane.xlu1 %214 }
 0x21b   :  { %v219_v41 = vsub.f32 %v205_v34, %v217_v39  ;;  %v218_v42 = vmul.f32 0.03125, %v215_v40 }
 0x21d   :  { %v220_v43 = vsub.f32 %v206_v36, %v218_v42  ;;  %v221_v44 = vmul.f32 %v219_v41, %v219_v41 }
 0x21f   :  { %v223_v45 = vsel %vm209_vm8, %v221_v44, 0.0  ;;  %v222_v46 = vmul.f32 %v220_v43, %v220_v43 }
 0x220   :  { %224 = vadd.xlane.f32.xlu0 %v223_v45 }
 0x221   :  { %v226_v47 = vsel %vm209_vm8, %v222_v46, 0.0 }
 0x224   :  { %227 = vadd.xlane.f32.xlu0 %v226_v47 }
 0x2ad   :  { %v225_v50 = vpop.xlane.xlu0 %224 }
 0x2ae   :  { %v229_v51 = vmul.f32 0.03125, %v225_v50 }
 0x2b0   :  { %v231_v52 = vadd.f32 1e-06, %v229_v51 }
 0x2b1   :  { %v228_v53 = vpop.xlane.xlu0 %227 }
 0x2b2   :  { %1862 = vrsqrt.f32 %v231_v52  ;;  %v230_v54 = vmul.f32 0.03125, %v228_v53 }
 0x2b4   :  { %v232_v55 = vadd.f32 1e-06, %v230_v54 }
 0x2b6   :  { %1864 = vrsqrt.f32 %v232_v55 }
 0x2bc   :  { %v1863_v56 = vpop.eup %1862 }
 0x2bd   :  { %v235_v57 = vmul.f32 %v1863_v56, %v219_v41 }
 0x2bf   :  { %v241_v60 = vmul.f32 %v1566_v58, %v235_v57 }
 0x2c0   :  { %v1865_v59 = vpop.eup %1864 }
 0x2c1   :  { %v236_v61 = vmul.f32 %v1865_v59, %v220_v43  ;;  %v2096_v0 = vadd.f32 %v1567_v62, %v241_v60 }
 0x2c3   :  { %v242_v63 = vmul.f32 %v1566_v58, %v236_v61 }
 0x2c5   :  { %v2098_v1 = vadd.f32 %v1567_v62, %v242_v63 }
 0x2c7   :  { %v251_v3 = vpack.c.bf16 %v2098_v1, %v2096_v0 }
 0x2c9   :  { %1694 = vmatmul.mubr.msk.bf16.vlgmr.msra.gmra.mrb[4].mxu0 %vm209_vm8, %v251_v3 }
 0x2ca   :  { %1699 = vmatprep.mubr.msk.bf16.mxu0 %vm2003_vm1, %v2002_v2 }
 0x39c   :  { %v310_v5 = vpop.f32.mrb[4].mxu0 }
 0x39d   :  { %v1695_v6 = vpop.f32.mrb[5].mxu0  ;;  %v311_v8 = vadd.f32 %v1568_v4, %v310_v5 }
 0x39e   :  { %v313_v7 = vpop.f32.mrb[6].mxu0 }
 0x39f   :  { %v314_v9 = vadd.f32 %v1568_v4, %v313_v7  ;;  %v1696_v10 = vpop.f32.mrb[7].mxu0 }
 0x3a1   :  { %v2105_v11 = vpack.c.bf16 %v314_v9, %v311_v8 }
 0x3a3   :  { %319 = vrot.lane.b32.xlu1 %v2105_v11, %s2004_s0 }
 0x3a7   :  { %396 = vrot.lane.b32.xlu1 %v2105_v11, %s1995_s25 }
 0x3ab   :  { %443 = vrot.lane.b32.xlu1 %v2105_v11, %s2005_s19 }
 0x415   :  { %v320_v12 = vpop.permute.xlu1 %319 }
 0x416   :  { %v326_v13 = vsel %vm321_vm9, %v320_v12, 0 }
 0x417   :  { %1698 = vmatpush3.bf16.xpose.msra.mxu0 %v326_v13 }
 0x418   :  { %1703 = vmatprep.subr.bf16.mxu0 %v2002_v2 }
 0x419   :  { %v397_v14 = vpop.permute.xlu1 %396 }
 0x41d   :  { %v444_v46 = vpop.permute.xlu1 %443 }
 0x41e   :  { %1700 = vmatmul.mubr.msk.bf16.vlgmr.msra.gmra.mrb[8].mxu0 %vm321_vm9, %v2105_v11 }
 0x41f   :  { %1704 = vmatpush3.bf16.msra.mxu0 %v397_v14  ;;  %1705 = vmatprep.mubr.msk.bf16.mxu0 %vm2003_vm1, %v2002_v2 }
 0x420   :  { %1709 = vmatprep.subr.bf16.mxu0 %v2002_v2 }
 0x4f1   :  { %v362_v15 = vpop.f32.mrb[8].mxu0 }
 0x4f2   :  { %v369_v17 = vmul.f32 0.25, %v362_v15  ;;  %v1701_v18 = vpop.f32.mrb[9].mxu0 }
 0x4f3   :  { %v365_v19 = vpop.f32.mrb[10].mxu0 }
 0x4f4   :  { %v370_v21 = vmul.f32 0.25, %v365_v19  ;;  %v1702_v22 = vpop.f32.mrb[11].mxu0  ;;  %v371_v23 = vadd.f32 %v369_v17, %v2123_v16 }
 0x4f6   :  { %v373_v24 = vsel %vm321_vm9, %v371_v23, -inf  ;;  %v372_v25 = vadd.f32 %v370_v21, %v2128_v20  ;;  %v1844_v21 = vld [vmem:[#allocation2 + $0x38] sm:$0xff]  }
 0x4f7   :  { %374 = vmax.xlane.f32.xlu0 %v373_v24 }
 0x4f8   :  { %v376_v26 = vsel %vm321_vm9, %v372_v25, -inf }
 0x4fb   :  { %377 = vmax.xlane.f32.xlu0 %v376_v26 }
 0x584   :  { %v375_v27 = vpop.xlane.xlu0 %374 }
 0x585   :  { %v379_v28 = vsub.f32 %v371_v23, %v375_v27 }
 0x587   :  { %v381_v29 = vmul.f32 1.442695, %v379_v28 }
 0x588   :  { %v378_v30 = vpop.xlane.xlu0 %377 }
 0x589   :  { %1866 = vpow2.f32 %v381_v29  ;;  %v380_v31 = vsub.f32 %v372_v25, %v378_v30 }
 0x58b   :  { %v383_v32 = vmul.f32 1.442695, %v380_v31 }
 0x58d   :  { %1868 = vpow2.f32 %v383_v32 }
 0x593   :  { %v1867_v33 = vpop.eup %1866 }
 0x594   :  { %v385_v34 = vsel %vm321_vm9, %v1867_v33, 0.0 }
 0x595   :  { %386 = vadd.xlane.f32.xlu0 %v385_v34 }
 0x597   :  { %v1869_v35 = vpop.eup %1868 }
 0x598   :  { %v388_v36 = vsel %vm321_vm9, %v1869_v35, 0.0 }
 0x599   :  { %389 = vadd.xlane.f32.xlu0 %v388_v36 }
 0x5af   :  { %445 = vrot.lane.b32.xlu0 %v2105_v11, %s2006_s1 }
 0x622   :  { %v387_v37 = vpop.xlane.xlu0 %386 }
 0x623   :  { %1870 = vrcp.f32 %v387_v37 }
 0x626   :  { %v390_v38 = vpop.xlane.xlu0 %389 }
 0x627   :  { %1872 = vrcp.f32 %v390_v38 }
 0x62a   :  { %v446_v43 = vpop.permute.xlu0 %445 }
 0x62b   :  { %v451_v45 = vsel %vm321_vm9, %v446_v43, 0 }
 0x62d   :  { %v1871_v39 = vpop.eup %1870 }
 0x62e   :  { %v393_v41 = vmul.f32 %v1871_v39, %v1867_v33  ;;  %v1576_v33 = vld [vmem:[#allocation5 + $0x20] ss:$0 sm:$0xff] }
 0x631   :  { %v1873_v40 = vpop.eup %1872 }
 0x632   :  { %v394_v42 = vmul.f32 %v1873_v40, %v1869_v35 }
 0x634   :  { %v395_v44 = vpack.c.bf16 %v394_v42, %v393_v41 }
 0x636   :  { %1706 = vmatmul.mubr.msk.bf16.vlgmr.msra.gmra.mrb[12].mxu0 %vm321_vm9, %v395_v44 }
 0x637   :  { %1710 = vmatpush3.bf16.xpose.msra.mxu0 %v451_v45  ;;  %1711 = vmatprep.mubr.msk.bf16.mxu0 %vm2003_vm1, %v2002_v2 }
 0x638   :  { %1721 = vmatprep.subr.bf16.mxu0 %v2002_v2 }
 0x63e   :  { %1712 = vmatmul.mubr.msk.bf16.vlgmr.msra.gmra.mrb[16].mxu0 %vm321_vm9, %v444_v46 }
 0x63f   :  { %1725 = vmatprep.mubr.msk.bf16.mxu0 %vm2003_vm1, %v2002_v2  ;;  %1722 = vmatpush3.bf16.msra.mxu0 %v1844_v21 }
 0x640   :  { %1723 = vmatprep.subr.bf16.mxu0 %v2002_v2 }
 0x709   :  { %v2146_v47 = vpop.f32.mrb[12].mxu0 }
 0x70a   :  { %v1707_v48 = vpop.f32.mrb[13].mxu0 }
 0x70b   :  { %v439_v49 = vpop.f32.mrb[14].mxu0 }
 0x70c   :  { %v1708_v50 = vpop.f32.mrb[15].mxu0 }
 0x711   :  { %v487_v51 = vpop.f32.mrb[16].mxu0 }
 0x712   :  { %v494_v52 = vmul.f32 0.25, %v487_v51  ;;  %v1713_v53 = vpop.f32.mrb[17].mxu0 }
 0x713   :  { %v490_v54 = vpop.f32.mrb[18].mxu0  ;;  %v1846_v53 = vld [vmem:[#allocation2 + $0x48] sm:$0xff]  }
 0x714   :  { %v495_v55 = vmul.f32 0.25, %v490_v54  ;;  %v1714_v56 = vpop.f32.mrb[19].mxu0  ;;  %v496_v57 = vadd.f32 %v494_v52, %v2123_v16 }
 0x716   :  { %v498_v58 = vsel %vm321_vm9, %v496_v57, -inf  ;;  %v497_v59 = vadd.f32 %v495_v55, %v2128_v20 }
 0x717   :  { %499 = vmax.xlane.f32.xlu1 %v498_v58 }
 0x718   :  { %v501_v60 = vsel %vm321_vm9, %v497_v59, -inf }
 0x719   :  { %502 = vmax.xlane.f32.xlu0 %v501_v60 }
 0x7a4   :  { %v500_v61 = vpop.xlane.xlu1 %499 }
 0x7a5   :  { %v504_v62 = vsub.f32 %v496_v57, %v500_v61  ;;  %v1580_v61 = vld [vmem:[#allocation5 + $0x28] ss:$0 sm:$0xff] }
 0x7a6   :  { %v503_v63 = vpop.xlane.xlu0 %502 }
 0x7a7   :  { %v506_v3 = vmul.f32 1.442695, %v504_v62  ;;  %v505_v4 = vsub.f32 %v497_v59, %v503_v63 }
 0x7a9   :  { %1874 = vpow2.f32 %v506_v3  ;;  %v508_v5 = vmul.f32 1.442695, %v505_v4 }
 0x7ab   :  { %1876 = vpow2.f32 %v508_v5  ;;  %v1581_v5 = vld [vmem:[#allocation5 + $0x30] ss:$0 sm:$0xff] }
 0x7b3   :  { %v1875_v6 = vpop.eup %1874 }
 0x7b4   :  { %v510_v7 = vsel %vm321_vm9, %v1875_v6, 0.0 }
 0x7b5   :  { %v1877_v8 = vpop.eup %1876  ;;  %511 = vadd.xlane.f32.xlu1 %v510_v7 }
 0x7b6   :  { %v513_v9 = vsel %vm321_vm9, %v1877_v8, 0.0 }
 0x7b9   :  { %514 = vadd.xlane.f32.xlu1 %v513_v9 }
 0x7ca   :  { %521 = vrot.lane.b32.xlu1 %v2105_v11, %s2007_s24  ;;  %v1845_v11 = vld [vmem:[#allocation2 + $0x40] sm:$0xff]  }
 0x7cb   :  { %1724 = vmatpush3.bf16.msra.mxu0 %v1845_v11 }
 0x7cc   :  { %1737 = vmatprep.subr.bf16.mxu0 %v2002_v2 }
 0x842   :  { %v512_v10 = vpop.xlane.xlu1 %511 }
 0x843   :  { %1878 = vrcp.f32 %v512_v10  ;;  %v1848_v10 = vld [vmem:[#allocation2 + $0x58] sm:$0xff]  }
 0x846   :  { %v515_v12 = vpop.xlane.xlu1 %514 }
 0x847   :  { %1880 = vrcp.f32 %v515_v12  ;;  %v1849_v12 = vld [vmem:[#allocation2 + $0x60] sm:$0xff]  }
 0x84a   :  { %v522_v13 = vpop.permute.xlu1 %521 }
 0x84b   :  { %1716 = vmatpush3.bf16.msra.mxu1 %v522_v13  ;;  %v1850_v13 = vld [vmem:[#allocation2 + $0x68] sm:$0xff]  }
 0x84c   :  { %1729 = vmatprep.subr.bf16.mxu1 %v2002_v2 }
 0x84d   :  { %v1879_v14 = vpop.eup %1878 }
 0x84e   :  { %v518_v17 = vmul.f32 %v1879_v14, %v1875_v6  ;;  %v1851_v14 = vld [vmem:[#allocation2 + $0x70] sm:$0xff]  }
 0x851   :  { %v1881_v15 = vpop.eup %1880 }
 0x852   :  { %v519_v18 = vmul.f32 %v1881_v15, %v1877_v8  ;;  %v1582_v15 = vld [vmem:[#allocation5 + $0x38] ss:$0 sm:$0xff] }
 0x854   :  { %v520_v19 = vpack.c.bf16 %v519_v18, %v518_v17 }
 0x856   :  { %1718 = vmatmul.mubr.msk.bf16.vlgmr.msra.gmra.mrb[4].mxu1 %vm321_vm9, %v520_v19 }
 0x857   :  { %1733 = vmatprep.mubr.msk.bf16.mxu1 %vm2003_vm1, %v2002_v2  ;;  %1730 = vmatpush3.bf16.msra.mxu1 %v1846_v53 }
 0x858   :  { %1731 = vmatprep.subr.bf16.mxu1 %v2002_v2 }
 0x929   :  { %v561_v22 = vpop.f32.mrb[4].mxu1 }
 0x92a   :  { %v1719_v23 = vpop.f32.mrb[5].mxu1 }
 0x92b   :  { %v564_v24 = vpop.f32.mrb[6].mxu1 }
 0x92c   :  { %v1827_v25 = vpack.i.bf16 %v564_v24, %v561_v22  ;;  %v1720_v26 = vpop.f32.mrb[7].mxu1 }
 0x92e   :  { %1828 = vrot.lane.b32.xlu0 %v1827_v25, %s2008_s26 }
 0x9a0   :  { %v1829_v27 = vpop.permute.xlu0 %1828 }
 0x9a1   :  { %v1831_v28 = vunpack.i.h.bf16 %v1829_v27  ;;  %v1830_v29 = vunpack.i.l.bf16 %v1829_v27 }
 0x9a3   :  { %v577_v30 = vsel %vm321_vm9, %v439_v49, %v1831_v28  ;;  %v576_v31 = vsel %vm321_vm9, %v2146_v47, %v1830_v29 }
 0x9a4   :  { %v578_v32 = vpack.c.bf16 %v577_v30, %v576_v31 }
 0x9a6   :  { %1726 = vmatmul.mubr.msk.bf16.vlgmr.msra.gmra.mrb[20].mxu0 %vm209_vm8, %v578_v32 }
 0x9a7   :  { %1745 = vmatprep.mubr.msk.bf16.mxu0 %vm2003_vm1, %v2002_v2  ;;  %1738 = vmatpush3.bf16.msra.mxu0 %v1848_v10 }
 0x9a8   :  { %1739 = vmatprep.subr.bf16.mxu0 %v2002_v2 }
 0x9ab   :  { %1740 = vmatpush3.bf16.msra.mxu0 %v1849_v12 }
 0x9ac   :  { %1741 = vmatprep.subr.bf16.mxu0 %v2002_v2 }
 0x9af   :  { %1742 = vmatpush3.bf16.msra.mxu0 %v1850_v13 }
 0x9b0   :  { %1743 = vmatprep.subr.bf16.mxu0 %v2002_v2 }
 0x9b3   :  { %1744 = vmatpush3.bf16.msra.mxu0 %v1851_v14 }
 0x9b4   :  { %1763 = vmatprep.subr.bf16.mxu0 %v2002_v2 }
 0xa79   :  { %v637_v34 = vpop.f32.mrb[20].mxu0 }
 0xa7a   :  { %v638_v35 = vadd.f32 %v1576_v33, %v637_v34  ;;  %v1727_v36 = vpop.f32.mrb[21].mxu0 }
 0xa7b   :  { %v640_v37 = vpop.f32.mrb[22].mxu0 }
 0xa7c   :  { %v641_v38 = vadd.f32 %v1576_v33, %v640_v37  ;;  %v1728_v39 = vpop.f32.mrb[23].mxu0  ;;  %v644_v40 = vadd.f32 %v638_v35, %v2096_v0 }
 0xa7e   :  { %v648_v41 = vsel %vm209_vm8, %v644_v40, 0.0  ;;  %v645_v42 = vadd.f32 %v641_v38, %v2098_v1  ;;  %v1847_v1 = vld [vmem:[#allocation2 + $0x50] sm:$0xff]  }
 0xa7f   :  { %649 = vadd.xlane.f32.xlu1 %v648_v41  ;;  %1732 = vmatpush3.bf16.msra.mxu1 %v1847_v1 }
 0xa80   :  { %v651_v43 = vsel %vm209_vm8, %v645_v42, 0.0  ;;  %1749 = vmatprep.subr.bf16.mxu1 %v2002_v2 }
 0xa81   :  { %652 = vadd.xlane.f32.xlu0 %v651_v43 }
 0xb0c   :  { %v650_v44 = vpop.xlane.xlu1 %649 }
 0xb0d   :  { %v654_v45 = vmul.f32 0.03125, %v650_v44 }
 0xb0e   :  { %v653_v46 = vpop.xlane.xlu0 %652 }
 0xb0f   :  { %v656_v47 = vsub.f32 %v644_v40, %v654_v45  ;;  %v655_v48 = vmul.f32 0.03125, %v653_v46 }
 0xb11   :  { %v657_v49 = vsub.f32 %v645_v42, %v655_v48  ;;  %v658_v50 = vmul.f32 %v656_v47, %v656_v47  ;;  %v1586_v42 = vld [vmem:[#allocation5 + $0x40] ss:$0 sm:$0xff] }
 0xb13   :  { %v660_v51 = vsel %vm209_vm8, %v658_v50, 0.0  ;;  %v659_v52 = vmul.f32 %v657_v49, %v657_v49 }
 0xb14   :  { %661 = vadd.xlane.f32.xlu1 %v660_v51 }
 0xb15   :  { %v663_v0 = vsel %vm209_vm8, %v659_v52, 0.0 }
 0xb16   :  { %664 = vadd.xlane.f32.xlu0 %v663_v0 }
 0xba1   :  { %v662_v54 = vpop.xlane.xlu1 %661 }
 0xba2   :  { %v666_v55 = vmul.f32 0.03125, %v662_v54 }
 0xba3   :  { %v665_v56 = vpop.xlane.xlu0 %664 }
 0xba4   :  { %v668_v57 = vadd.f32 1e-06, %v666_v55  ;;  %v667_v58 = vmul.f32 0.03125, %v665_v56 }
 0xba6   :  { %1882 = vrsqrt.f32 %v668_v57  ;;  %v669_v59 = vadd.f32 1e-06, %v667_v58 }
 0xba8   :  { %1884 = vrsqrt.f32 %v669_v59 }
 0xbb0   :  { %v1883_v60 = vpop.eup %1882 }
 0xbb1   :  { %v672_v62 = vmul.f32 %v1883_v60, %v656_v47 }
 0xbb2   :  { %v1885_v63 = vpop.eup %1884 }
 0xbb3   :  { %v678_v3 = vmul.f32 %v1580_v61, %v672_v62  ;;  %v673_v4 = vmul.f32 %v1885_v63, %v657_v49  ;;  %v1853_v62 = vld [vmem:[#allocation2 + $0x80] sm:$0xff]  }
 0xbb5   :  { %v679_v6 = vmul.f32 %v1580_v61, %v673_v4  ;;  %v684_v7 = vadd.f32 %v1581_v5, %v678_v3  ;;  %v1852_v61 = vld [vmem:[#allocation2 + $0x78] sm:$0xff]  }
 0xbb7   :  { %v685_v8 = vadd.f32 %v1581_v5, %v679_v6 }
 0xbb9   :  { %v686_v9 = vpack.c.bf16 %v685_v8, %v684_v7 }
 0xbbb   :  { %1734 = vmatmul.mubr.msk.bf16.vlgmr.msra.gmra.mrb[8].mxu1 %vm209_vm8, %v686_v9  ;;  %v1592_v9 = vld [vmem:[#allocation5 + $0x48] ss:$0 sm:$0xff] }
 0xbbc   :  { %1753 = vmatprep.mubr.msk.bf16.mxu1 %vm2003_vm1, %v2002_v2  ;;  %1750 = vmatpush3.bf16.msra.mxu1 %v1852_v61 }
 0xbbd   :  { %1751 = vmatprep.subr.bf16.mxu1 %v2002_v2 }
 0xbc0   :  { %1752 = vmatpush3.bf16.msra.mxu1 %v1853_v62 }
 0xbc1   :  { %1757 = vmatprep.subr.bf16.mxu1 %v2002_v2 }
 0xc8e   :  { %v745_v17 = vpop.f32.mrb[8].mxu1 }
 0xc8f   :  { %v746_v18 = vadd.f32 %v1582_v15, %v745_v17  ;;  %v1735_v19 = vpop.f32.mrb[9].mxu1 }
 0xc90   :  { %v748_v21 = vpop.f32.mrb[10].mxu1 }
 0xc91   :  { %v754_v11 = vmul.f32 0.044715, %v746_v18  ;;  %v749_v22 = vadd.f32 %v1582_v15, %v748_v21  ;;  %v1736_v23 = vpop.f32.mrb[11].mxu1  ;;  %v752_v36 = vmul.f32 0.5, %v746_v18  ;;  %v1593_v15 = vld [vmem:[#allocation5 + $0x50] ss:$0 sm:$0xff] }
 0xc93   :  { %v756_v24 = vmul.f32 %v754_v11, %v746_v18  ;;  %v755_v25 = vmul.f32 0.044715, %v749_v22  ;;  %v753_v37 = vmul.f32 0.5, %v749_v22  ;;  %v1594_v11 = vld [vmem:[#allocation5 + $0x58] ss:$0 sm:$0xff] }
 0xc95   :  { %v758_v26 = vmul.f32 %v756_v24, %v746_v18  ;;  %v757_v27 = vmul.f32 %v755_v25, %v749_v22 }
 0xc97   :  { %v760_v28 = vadd.f32 %v758_v26, %v746_v18  ;;  %v759_v29 = vmul.f32 %v757_v27, %v749_v22 }
 0xc99   :  { %v762_v30 = vmul.f32 0.7978846, %v760_v28  ;;  %v761_v31 = vadd.f32 %v759_v29, %v749_v22 }
 0xc9b   :  { %1886 = vtanh.f32 %v762_v30  ;;  %v763_v32 = vmul.f32 0.7978846, %v761_v31 }
 0xc9d   :  { %1888 = vtanh.f32 %v763_v32 }
 0xca5   :  { %v1887_v33 = vpop.eup %1886 }
 0xca6   :  { %v766_v34 = vadd.f32 1.0, %v1887_v33 }
 0xca7   :  { %v1889_v35 = vpop.eup %1888 }
 0xca8   :  { %v767_v38 = vadd.f32 1.0, %v1889_v35  ;;  %v768_v39 = vmul.f32 %v766_v34, %v752_v36 }
 0xcaa   :  { %v769_v40 = vmul.f32 %v767_v38, %v753_v37 }
 0xcac   :  { %v770_v41 = vpack.c.bf16 %v769_v40, %v768_v39 }
 0xcae   :  { %1746 = vmatmul.mubr.msk.bf16.vlgmr.msra.gmra.mrb[24].mxu0 %vm159_vm7, %v770_v41 }
 0xcaf   :  { %1765 = vmatprep.mubr.msk.bf16.mxu0 %vm2003_vm1, %v2002_v2 }
 0xd81   :  { %v845_v43 = vpop.f32.mrb[24].mxu0 }
 0xd82   :  { %v846_v44 = vadd.f32 %v1586_v42, %v845_v43  ;;  %v1747_v45 = vpop.f32.mrb[25].mxu0 }
 0xd83   :  { %v848_v46 = vpop.f32.mrb[26].mxu0 }
 0xd84   :  { %v849_v47 = vadd.f32 %v1586_v42, %v848_v46  ;;  %v1748_v48 = vpop.f32.mrb[27].mxu0  ;;  %v852_v49 = vadd.f32 %v846_v44, %v684_v7 }
 0xd86   :  { %v856_v50 = vsel %vm209_vm8, %v852_v49, 0.0  ;;  %v853_v51 = vadd.f32 %v849_v47, %v685_v8 }
 0xd87   :  { %857 = vadd.xlane.f32.xlu1 %v856_v50 }
 0xd88   :  { %v859_v52 = vsel %vm209_vm8, %v853_v51, 0.0 }
 0xd89   :  { %860 = vadd.xlane.f32.xlu0 %v859_v52 }
 0xe14   :  { %v858_v0 = vpop.xlane.xlu1 %857 }
 0xe15   :  { %v862_v53 = vmul.f32 0.03125, %v858_v0 }
 0xe16   :  { %v861_v1 = vpop.xlane.xlu0 %860 }
 0xe17   :  { %v864_v54 = vsub.f32 %v852_v49, %v862_v53  ;;  %v863_v55 = vmul.f32 0.03125, %v861_v1 }
 0xe19   :  { %v865_v56 = vsub.f32 %v853_v51, %v863_v55  ;;  %v866_v57 = vmul.f32 %v864_v54, %v864_v54 }
 0xe1b   :  { %v868_v58 = vsel %vm209_vm8, %v866_v57, 0.0  ;;  %v867_v59 = vmul.f32 %v865_v56, %v865_v56 }
 0xe1c   :  { %869 = vadd.xlane.f32.xlu1 %v868_v58 }
 0xe1d   :  { %v871_v60 = vsel %vm209_vm8, %v867_v59, 0.0 }
 0xe1e   :  { %872 = vadd.xlane.f32.xlu0 %v871_v60 }
 0xea9   :  { %v870_v63 = vpop.xlane.xlu1 %869 }
 0xeaa   :  { %v874_v3 = vmul.f32 0.03125, %v870_v63 }
 0xeab   :  { %v873_v4 = vpop.xlane.xlu0 %872 }
 0xeac   :  { %v876_v5 = vadd.f32 1e-06, %v874_v3  ;;  %v875_v6 = vmul.f32 0.03125, %v873_v4 }
 0xeae   :  { %1890 = vrsqrt.f32 %v876_v5  ;;  %v877_v7 = vadd.f32 1e-06, %v875_v6 }
 0xeb0   :  { %1892 = vrsqrt.f32 %v877_v7 }
 0xeb8   :  { %v1891_v8 = vpop.eup %1890 }
 0xeb9   :  { %v880_v10 = vmul.f32 %v1891_v8, %v864_v54 }
 0xeba   :  { %v1893_v12 = vpop.eup %1892 }
 0xebb   :  { %v886_v13 = vmul.f32 %v1592_v9, %v880_v10  ;;  %v881_v14 = vmul.f32 %v1893_v12, %v865_v56 }
 0xebd   :  { %v887_v17 = vmul.f32 %v1592_v9, %v881_v14  ;;  %v2193_v18 = vadd.f32 %v1593_v15, %v886_v13 }
 0xebf   :  { %v2195_v19 = vadd.f32 %v1593_v15, %v887_v17 }
 0xec1   :  { %v894_v21 = vpack.c.bf16 %v2195_v19, %v2193_v18 }
 0xec3   :  { %1754 = vmatmul.mubr.msk.bf16.vlgmr.msra.gmra.mrb[12].mxu1 %vm209_vm8, %v894_v21 }
 0xec4   :  { %1759 = vmatprep.mubr.msk.bf16.mxu1 %vm2003_vm1, %v2002_v2 }
 0xf96   :  { %v953_v22 = vpop.f32.mrb[12].mxu1 }
 0xf97   :  { %v1755_v23 = vpop.f32.mrb[13].mxu1  ;;  %v954_v25 = vadd.f32 %v1594_v11, %v953_v22 }
 0xf98   :  { %v956_v24 = vpop.f32.mrb[14].mxu1 }
 0xf99   :  { %v957_v26 = vadd.f32 %v1594_v11, %v956_v24  ;;  %v1756_v27 = vpop.f32.mrb[15].mxu1 }
 0xf9b   :  { %v2202_v28 = vpack.c.bf16 %v957_v26, %v954_v25 }
 0xf9d   :  { %1087 = vrot.lane.b32.xlu0 %v2202_v28, %s2006_s1  ;;  %962 = vrot.lane.b32.xlu1 %v2202_v28, %s2004_s0 }
 0xfa1   :  { %1085 = vrot.lane.b32.xlu1 %v2202_v28, %s2005_s19 }
0x100f   :  { %v963_v29 = vpop.permute.xlu1 %962  ;;  %v1088_v31 = vpop.permute.xlu0 %1087 }
0x1010   :  { %v968_v30 = vsel %vm321_vm9, %v963_v29, 0  ;;  %v1093_v32 = vsel %vm321_vm9, %v1088_v31, 0  ;;  %v1854_v29 = vld [vmem:[#allocation2 + $0x88] sm:$0xff]  }
0x1011   :  { %1758 = vmatpush3.bf16.xpose.msra.mxu1 %v968_v30 }
0x1012   :  { %1769 = vmatprep.subr.bf16.mxu1 %v2002_v2 }
0x1013   :  { %v1086_v33 = vpop.permute.xlu1 %1085 }
0x1018   :  { %1760 = vmatmul.mubr.msk.bf16.vlgmr.msra.gmra.mrb[16].mxu1 %vm321_vm9, %v2202_v28 }
0x1019   :  { %1770 = vmatpush3.bf16.xpose.msra.mxu1 %v1093_v32  ;;  %1771 = vmatprep.mubr.msk.bf16.mxu1 %vm2003_vm1, %v2002_v2  ;;  %v1855_v32 = vld [vmem:[#allocation2 + $0x90] sm:$0xff]  }
0x101a   :  { %1781 = vmatprep.subr.bf16.mxu1 %v2002_v2 }
0x1020   :  { %1772 = vmatmul.mubr.msk.bf16.vlgmr.msra.gmra.mrb[20].mxu1 %vm321_vm9, %v1086_v33 }
0x1021   :  { %1785 = vmatprep.mubr.msk.bf16.mxu1 %vm2003_vm1, %v2002_v2  ;;  %1782 = vmatpush3.bf16.msra.mxu1 %v1854_v29 }
0x1022   :  { %1783 = vmatprep.subr.bf16.mxu1 %v2002_v2 }
0x1025   :  { %1784 = vmatpush3.bf16.msra.mxu1 %v1855_v32 }
0x1026   :  { %1797 = vmatprep.subr.bf16.mxu1 %v2002_v2 }
0x10eb   :  { %v1004_v34 = vpop.f32.mrb[16].mxu1 }
0x10ec   :  { %v1011_v35 = vmul.f32 0.25, %v1004_v34  ;;  %v1761_v36 = vpop.f32.mrb[17].mxu1 }
0x10ed   :  { %v1007_v37 = vpop.f32.mrb[18].mxu1 }
0x10ee   :  { %v1012_v38 = vmul.f32 0.25, %v1007_v37  ;;  %v1762_v39 = vpop.f32.mrb[19].mxu1  ;;  %v1013_v40 = vadd.f32 %v1011_v35, %v2123_v16 }
0x10f0   :  { %v1015_v41 = vsel %vm321_vm9, %v1013_v40, -inf  ;;  %v1014_v42 = vadd.f32 %v1012_v38, %v2128_v20 }
0x10f1   :  { %1016 = vmax.xlane.f32.xlu1 %v1015_v41 }
0x10f2   :  { %v1018_v43 = vsel %vm321_vm9, %v1014_v42, -inf }
0x10f3   :  { %1019 = vmax.xlane.f32.xlu0 %v1018_v43  ;;  %v1129_v44 = vpop.f32.mrb[20].mxu1 }
0x10f4   :  { %v1136_v45 = vmul.f32 0.25, %v1129_v44  ;;  %v1773_v46 = vpop.f32.mrb[21].mxu1 }
0x10f5   :  { %v1132_v47 = vpop.f32.mrb[22].mxu1  ;;  %v1602_v46 = vld [vmem:[#allocation5 + $0x60] ss:$0 sm:$0xff] }
0x10f6   :  { %v1137_v48 = vmul.f32 0.25, %v1132_v47  ;;  %v1774_v49 = vpop.f32.mrb[23].mxu1  ;;  %v1138_v50 = vadd.f32 %v1136_v45, %v2123_v16 }
0x10f8   :  { %v1140_v51 = vsel %vm321_vm9, %v1138_v50, -inf  ;;  %v1139_v52 = vadd.f32 %v1137_v48, %v2128_v20 }
0x10f9   :  { %1141 = vmax.xlane.f32.xlu0 %v1140_v51 }
0x10fa   :  { %v1143_v0 = vsel %vm321_vm9, %v1139_v52, -inf }
0x10fb   :  { %1144 = vmax.xlane.f32.xlu1 %v1143_v0 }
0x117e   :  { %v1017_v53 = vpop.xlane.xlu1 %1016 }
0x117f   :  { %v1021_v1 = vsub.f32 %v1013_v40, %v1017_v53 }
0x1180   :  { %v1020_v54 = vpop.xlane.xlu0 %1019 }
0x1181   :  { %v1023_v55 = vmul.f32 1.442695, %v1021_v1  ;;  %v1022_v56 = vsub.f32 %v1014_v42, %v1020_v54 }
0x1183   :  { %1894 = vpow2.f32 %v1023_v55  ;;  %v1025_v57 = vmul.f32 1.442695, %v1022_v56 }
0x1185   :  { %1896 = vpow2.f32 %v1025_v57 }
0x1186   :  { %v1142_v58 = vpop.xlane.xlu0 %1141 }
0x1187   :  { %v1146_v59 = vsub.f32 %v1138_v50, %v1142_v58 }
0x1188   :  { %v1145_v60 = vpop.xlane.xlu1 %1144 }
0x1189   :  { %v1148_v16 = vmul.f32 1.442695, %v1146_v59  ;;  %v1147_v61 = vsub.f32 %v1139_v52, %v1145_v60 }
0x118b   :  { %1898 = vpow2.f32 %v1148_v16  ;;  %v1150_v62 = vmul.f32 1.442695, %v1147_v61 }
0x118d   :  { %v1895_v20 = vpop.eup %1894  ;;  %1900 = vpow2.f32 %v1150_v62 }
0x118e   :  { %v1027_v63 = vsel %vm321_vm9, %v1895_v20, 0.0 }
0x118f   :  { %v1897_v3 = vpop.eup %1896  ;;  %1028 = vadd.xlane.f32.xlu0 %v1027_v63 }
0x1190   :  { %v1030_v4 = vsel %vm321_vm9, %v1897_v3, 0.0 }
0x1191   :  { %1031 = vadd.xlane.f32.xlu1 %v1030_v4 }
0x1195   :  { %v1899_v5 = vpop.eup %1898 }
0x1196   :  { %v1152_v6 = vsel %vm321_vm9, %v1899_v5, 0.0 }
0x1197   :  { %v1901_v7 = vpop.eup %1900  ;;  %1153 = vadd.xlane.f32.xlu0 %v1152_v6 }
0x1198   :  { %v1155_v8 = vsel %vm321_vm9, %v1901_v7, 0.0 }
0x1199   :  { %1156 = vadd.xlane.f32.xlu1 %v1155_v8 }
0x11aa   :  { %1163 = vrot.lane.b32.xlu1 %v2202_v28, %s2007_s24 }
0x11ad   :  { %1038 = vrot.lane.b32.xlu0 %v2202_v28, %s1995_s25  ;;  %s2009_s25 = smov [#allocation7]  }
0x11ae   :  { %s1543_s27 = sshll.u32 %s2009_s25, 4  ;;  %s1544_s27 = int_to_ptr.vmem [resolvable:$true] %s1543_s27 }
0x11af   :  { %s1966_s28 = scalar_lea.vmem %s1544_s27, 256  ;;  %p1971_p3 = scmp.lt.s32.totalorder %s1544_s27, %s1544_s27 }
0x11b0   :  { %p1967_p2 = scmp.ne.s32.totalorder %s1544_s27, %s1966_s28  ;;  %p1972_p4 = scmp.lt.s32.totalorder %s1966_s28, %s1966_s28 }
0x11b2   :  { %p1973_p5 = por %p1972_p4, %p1971_p3 }
0x11b4   :  { %p1974_p6 = pnand %p1973_p5, %p1967_p2 }
0x121c   :  { %v1029_v9 = vpop.xlane.xlu0 %1028 }
0x121d   :  { %1902 = vrcp.f32 %v1029_v9 }
0x121e   :  { %v1032_v10 = vpop.xlane.xlu1 %1031 }
0x121f   :  { %1904 = vrcp.f32 %v1032_v10  ;;  %v1606_v10 = vld [vmem:[#allocation5 + $0x68] ss:$0 sm:$0xff] }
0x1224   :  { %v1154_v12 = vpop.xlane.xlu0 %1153 }
0x1225   :  { %1906 = vrcp.f32 %v1154_v12 }
0x1226   :  { %v1157_v13 = vpop.xlane.xlu1 %1156 }
0x1227   :  { %v1903_v14 = vpop.eup %1902  ;;  %1908 = vrcp.f32 %v1157_v13 }
0x1228   :  { %v1039_v15 = vpop.permute.xlu0 %1038  ;;  %v1035_v21 = vmul.f32 %v1903_v14, %v1895_v20  ;;  %v1856_v20 = vld [vmem:[#allocation2 + $0x98] sm:$0xff]  }
0x1229   :  { %v1905_v17 = vpop.eup %1904  ;;  %1764 = vmatpush3.bf16.msra.mxu0 %v1039_v15  ;;  %v1607_v15 = vld [vmem:[#allocation5 + $0x70] ss:$0 sm:$0xff] }
0x122a   :  { %v1036_v11 = vmul.f32 %v1905_v17, %v1897_v3  ;;  %1775 = vmatprep.subr.bf16.mxu0 %v2002_v2  ;;  %v1164_v23 = vpop.permute.xlu1 %1163 }
0x122c   :  { %v1037_v22 = vpack.c.bf16 %v1036_v11, %v1035_v21 }
0x122e   :  { %1766 = vmatmul.mubr.msk.bf16.vlgmr.msra.gmra.mrb[28].mxu0 %vm321_vm9, %v1037_v22 }
0x122f   :  { %v1907_v24 = vpop.eup %1906  ;;  %1776 = vmatpush3.bf16.msra.mxu0 %v1164_v23  ;;  %1777 = vmatprep.mubr.msk.bf16.mxu0 %vm2003_vm1, %v2002_v2  ;;  %v1858_v23 = vld [vmem:[#allocation2 + $0xa8] sm:$0xff]  }
0x1230   :  { %1789 = vmatprep.subr.bf16.mxu0 %v2002_v2  ;;  %v1160_v26 = vmul.f32 %v1907_v24, %v1899_v5  ;;  %v1859_v24 = vld [vmem:[#allocation2 + $0xb0] sm:$0xff]  }
0x1231   :  { %v1909_v25 = vpop.eup %1908 }
0x1232   :  { %v1161_v27 = vmul.f32 %v1909_v25, %v1901_v7  ;;  %v1860_v25 = vld [vmem:[#allocation2 + $0xb8] sm:$0xff]  }
0x1234   :  { %v1162_v28 = vpack.c.bf16 %v1161_v27, %v1160_v26  ;;  %v1861_v26 = vld [vmem:[#allocation2 + $0xc0] sm:$0xff]  }
0x1235   :  { %v1608_v27 = vld [vmem:[#allocation5 + $0x78] ss:$0 sm:$0xff] }
0x1236   :  { %1778 = vmatmul.mubr.msk.bf16.vlgmr.msra.gmra.mrb[32].mxu0 %vm321_vm9, %v1162_v28 }
0x1237   :  { %1793 = vmatprep.mubr.msk.bf16.mxu0 %vm2003_vm1, %v2002_v2  ;;  %1790 = vmatpush3.bf16.msra.mxu0 %v1856_v20 }
0x1238   :  { %1791 = vmatprep.subr.bf16.mxu0 %v2002_v2 }
0x1301   :  { %v1078_v30 = vpop.f32.mrb[28].mxu0 }
0x1302   :  { %v1767_v31 = vpop.f32.mrb[29].mxu0 }
0x1303   :  { %v1081_v33 = vpop.f32.mrb[30].mxu0 }
0x1304   :  { %v1768_v34 = vpop.f32.mrb[31].mxu0 }
0x1309   :  { %v1203_v35 = vpop.f32.mrb[32].mxu0 }
0x130a   :  { %v1779_v36 = vpop.f32.mrb[33].mxu0 }
0x130b   :  { %v1206_v37 = vpop.f32.mrb[34].mxu0 }
0x130c   :  { %v1832_v38 = vpack.i.bf16 %v1206_v37, %v1203_v35  ;;  %v1780_v39 = vpop.f32.mrb[35].mxu0 }
0x130e   :  { %1833 = vrot.lane.b32.xlu1 %v1832_v38, %s2008_s26 }
0x1380   :  { %v1834_v40 = vpop.permute.xlu1 %1833 }
0x1381   :  { %v1836_v41 = vunpack.i.h.bf16 %v1834_v40  ;;  %v1835_v42 = vunpack.i.l.bf16 %v1834_v40 }
0x1383   :  { %v1219_v43 = vsel %vm321_vm9, %v1081_v33, %v1836_v41  ;;  %v1218_v44 = vsel %vm321_vm9, %v1078_v30, %v1835_v42 }
0x1384   :  { %v1220_v45 = vpack.c.bf16 %v1219_v43, %v1218_v44 }
0x1386   :  { %1786 = vmatmul.mubr.msk.bf16.vlgmr.msra.gmra.mrb[24].mxu1 %vm209_vm8, %v1220_v45 }
0x1387   :  { %1805 = vmatprep.mubr.msk.bf16.mxu1 %vm2003_vm1, %v2002_v2  ;;  %1798 = vmatpush3.bf16.msra.mxu1 %v1858_v23 }
0x1388   :  { %1799 = vmatprep.subr.bf16.mxu1 %v2002_v2 }
0x138b   :  { %1800 = vmatpush3.bf16.msra.mxu1 %v1859_v24 }
0x138c   :  { %1801 = vmatprep.subr.bf16.mxu1 %v2002_v2 }
0x138f   :  { %1802 = vmatpush3.bf16.msra.mxu1 %v1860_v25 }
0x1390   :  { %1803 = vmatprep.subr.bf16.mxu1 %v2002_v2 }
0x1393   :  { %1804 = vmatpush3.bf16.msra.mxu1 %v1861_v26 }
0x1459   :  { %v1279_v47 = vpop.f32.mrb[24].mxu1 }
0x145a   :  { %v1280_v48 = vadd.f32 %v1602_v46, %v1279_v47  ;;  %v1787_v49 = vpop.f32.mrb[25].mxu1 }
0x145b   :  { %v1282_v50 = vpop.f32.mrb[26].mxu1 }
0x145c   :  { %v1283_v51 = vadd.f32 %v1602_v46, %v1282_v50  ;;  %v1788_v52 = vpop.f32.mrb[27].mxu1  ;;  %v1286_v0 = vadd.f32 %v1280_v48, %v2193_v18 }
0x145d   :  { %v1612_v52 = vld [vmem:[#allocation5 + $0x80] ss:$0 sm:$0xff] }
0x145e   :  { %v1290_v53 = vsel %vm209_vm8, %v1286_v0, 0.0  ;;  %v1287_v1 = vadd.f32 %v1283_v51, %v2195_v19  ;;  %v1857_v19 = vld [vmem:[#allocation2 + $0xa0] sm:$0xff]  }
0x145f   :  { %1291 = vadd.xlane.f32.xlu0 %v1290_v53  ;;  %1792 = vmatpush3.bf16.msra.mxu0 %v1857_v19 }
0x1460   :  { %v1293_v54 = vsel %vm209_vm8, %v1287_v1, 0.0 }
0x1461   :  { %1294 = vadd.xlane.f32.xlu1 %v1293_v54 }
0x14ec   :  { %v1292_v55 = vpop.xlane.xlu0 %1291 }
0x14ed   :  { %v1296_v56 = vmul.f32 0.03125, %v1292_v55 }
0x14ee   :  { %v1295_v57 = vpop.xlane.xlu1 %1294 }
0x14ef   :  { %v1298_v58 = vsub.f32 %v1286_v0, %v1296_v56  ;;  %v1297_v59 = vmul.f32 0.03125, %v1295_v57 }
0x14f1   :  { %v1299_v60 = vsub.f32 %v1287_v1, %v1297_v59  ;;  %v1300_v16 = vmul.f32 %v1298_v58, %v1298_v58 }
0x14f3   :  { %v1302_v61 = vsel %vm209_vm8, %v1300_v16, 0.0  ;;  %v1301_v62 = vmul.f32 %v1299_v60, %v1299_v60 }
0x14f4   :  { %1303 = vadd.xlane.f32.xlu0 %v1302_v61 }
0x14f5   :  { %v1305_v18 = vsel %vm209_vm8, %v1301_v62, 0.0 }
0x14f8   :  { %1306 = vadd.xlane.f32.xlu0 %v1305_v18 }
0x1581   :  { %v1304_v63 = vpop.xlane.xlu0 %1303 }
0x1582   :  { %v1308_v3 = vmul.f32 0.03125, %v1304_v63 }
0x1584   :  { %v1310_v4 = vadd.f32 1e-06, %v1308_v3 }
0x1585   :  { %v1307_v5 = vpop.xlane.xlu0 %1306 }
0x1586   :  { %1910 = vrsqrt.f32 %v1310_v4  ;;  %v1309_v6 = vmul.f32 0.03125, %v1307_v5 }
0x1588   :  { %v1311_v7 = vadd.f32 1e-06, %v1309_v6 }
0x158a   :  { %1912 = vrsqrt.f32 %v1311_v7 }
0x1590   :  { %v1911_v8 = vpop.eup %1910 }
0x1591   :  { %v1314_v9 = vmul.f32 %v1911_v8, %v1298_v58 }
0x1593   :  { %v1320_v13 = vmul.f32 %v1606_v10, %v1314_v9 }
0x1594   :  { %v1913_v12 = vpop.eup %1912 }
0x1595   :  { %v1315_v14 = vmul.f32 %v1913_v12, %v1299_v60  ;;  %v1326_v21 = vadd.f32 %v1607_v15, %v1320_v13 }
0x1597   :  { %v1321_v17 = vmul.f32 %v1606_v10, %v1315_v14  ;;  %v1618_v14 = vld [vmem:[#allocation5 + $0x88] ss:$0 sm:$0xff] }
0x1599   :  { %v1327_v11 = vadd.f32 %v1607_v15, %v1321_v17 }
0x159b   :  { %v1328_v22 = vpack.c.bf16 %v1327_v11, %v1326_v21 }
0x159d   :  { %1794 = vmatmul.mubr.msk.bf16.vlgmr.msra.gmra.mrb[36].mxu0 %vm209_vm8, %v1328_v22 }
0x1670   :  { %v1387_v28 = vpop.f32.mrb[36].mxu0 }
0x1671   :  { %v1388_v29 = vadd.f32 %v1608_v27, %v1387_v28  ;;  %v1795_v30 = vpop.f32.mrb[37].mxu0 }
0x1672   :  { %v1390_v31 = vpop.f32.mrb[38].mxu0 }
0x1673   :  { %v1396_v32 = vmul.f32 0.044715, %v1388_v29  ;;  %v1391_v33 = vadd.f32 %v1608_v27, %v1390_v31  ;;  %v1796_v34 = vpop.f32.mrb[39].mxu0  ;;  %v1394_v46 = vmul.f32 0.5, %v1388_v29 }
0x1675   :  { %v1398_v35 = vmul.f32 %v1396_v32, %v1388_v29  ;;  %v1397_v36 = vmul.f32 0.044715, %v1391_v33  ;;  %v1395_v47 = vmul.f32 0.5, %v1391_v33 }
0x1677   :  { %v1400_v37 = vmul.f32 %v1398_v35, %v1388_v29  ;;  %v1399_v38 = vmul.f32 %v1397_v36, %v1391_v33 }
0x1679   :  { %v1402_v39 = vadd.f32 %v1400_v37, %v1388_v29  ;;  %v1401_v40 = vmul.f32 %v1399_v38, %v1391_v33 }
0x167b   :  { %v1404_v41 = vmul.f32 0.7978846, %v1402_v39  ;;  %v1403_v42 = vadd.f32 %v1401_v40, %v1391_v33 }
0x167d   :  { %1914 = vtanh.f32 %v1404_v41  ;;  %v1405_v43 = vmul.f32 0.7978846, %v1403_v42 }
0x167f   :  { %1916 = vtanh.f32 %v1405_v43 }
0x1687   :  { %v1915_v2 = vpop.eup %1914 }
0x1688   :  { %v1408_v44 = vadd.f32 1.0, %v1915_v2 }
0x1689   :  { %v1917_v45 = vpop.eup %1916 }
0x168a   :  { %v1409_v48 = vadd.f32 1.0, %v1917_v45  ;;  %v1410_v49 = vmul.f32 %v1408_v44, %v1394_v46 }
0x168c   :  { %v1411_v50 = vmul.f32 %v1409_v48, %v1395_v47 }
0x168e   :  { %v1412_v51 = vpack.c.bf16 %v1411_v50, %v1410_v49 }
0x1690   :  { %1806 = vmatmul.mubr.msk.bf16.vlgmr.msra.gmra.mrb[28].mxu1 %vm159_vm7, %v1412_v51 }
0x1763   :  { %v1487_v0 = vpop.f32.mrb[28].mxu1 }
0x1764   :  { %v1488_v53 = vadd.f32 %v1612_v52, %v1487_v0  ;;  %v1807_v1 = vpop.f32.mrb[29].mxu1 }
0x1765   :  { %v1490_v54 = vpop.f32.mrb[30].mxu1 }
0x1766   :  { %v1491_v55 = vadd.f32 %v1612_v52, %v1490_v54  ;;  %v1808_v56 = vpop.f32.mrb[31].mxu1  ;;  %v1494_v57 = vadd.f32 %v1488_v53, %v1326_v21  ;;  %v1619_v21 = vld [vmem:[#allocation5 + $0x90] ss:$0 sm:$0xff] }
0x1768   :  { %v1498_v58 = vsel %vm209_vm8, %v1494_v57, 0.0  ;;  %v1495_v59 = vadd.f32 %v1491_v55, %v1327_v11 }
0x1769   :  { %1499 = vadd.xlane.f32.xlu1 %v1498_v58 }
0x176a   :  { %v1501_v60 = vsel %vm209_vm8, %v1495_v59, 0.0 }
0x176b   :  { %1502 = vadd.xlane.f32.xlu0 %v1501_v60 }
0x17f6   :  { %v1500_v16 = vpop.xlane.xlu1 %1499 }
0x17f7   :  { %v1504_v61 = vmul.f32 0.03125, %v1500_v16 }
0x17f8   :  { %v1503_v62 = vpop.xlane.xlu0 %1502 }
0x17f9   :  { %v1506_v18 = vsub.f32 %v1494_v57, %v1504_v61  ;;  %v1505_v20 = vmul.f32 0.03125, %v1503_v62 }
0x17fb   :  { %v1507_v19 = vsub.f32 %v1495_v59, %v1505_v20  ;;  %v1508_v63 = vmul.f32 %v1506_v18, %v1506_v18 }
0x17fd   :  { %v1510_v3 = vsel %vm209_vm8, %v1508_v63, 0.0  ;;  %v1509_v4 = vmul.f32 %v1507_v19, %v1507_v19 }
0x17fe   :  { %1511 = vadd.xlane.f32.xlu1 %v1510_v3 }
0x17ff   :  { %v1513_v5 = vsel %vm209_vm8, %v1509_v4, 0.0 }
0x1800   :  { %1514 = vadd.xlane.f32.xlu0 %v1513_v5 }
0x188b   :  { %v1512_v6 = vpop.xlane.xlu1 %1511 }
0x188c   :  { %v1516_v7 = vmul.f32 0.03125, %v1512_v6 }
0x188d   :  { %v1515_v8 = vpop.xlane.xlu0 %1514 }
0x188e   :  { %v1518_v9 = vadd.f32 1e-06, %v1516_v7  ;;  %v1517_v10 = vmul.f32 0.03125, %v1515_v8 }
0x1890   :  { %1918 = vrsqrt.f32 %v1518_v9  ;;  %v1519_v12 = vadd.f32 1e-06, %v1517_v10 }
0x1892   :  { %1920 = vrsqrt.f32 %v1519_v12 }
0x189a   :  { %v1919_v13 = vpop.eup %1918 }
0x189b   :  { %v1522_v15 = vmul.f32 %v1919_v13, %v1506_v18 }
0x189c   :  { %v1921_v17 = vpop.eup %1920 }
0x189d   :  { %v1523_v11 = vmul.f32 %v1921_v17, %v1507_v19  ;;  %v1528_v22 = vmul.f32 %v1618_v14, %v1522_v15 }
0x189f   :  { %v1529_v23 = vmul.f32 %v1618_v14, %v1523_v11  ;;  %v1534_v24 = vadd.f32 %v1619_v21, %v1528_v22 }
0x18a1   :  { %v1535_v25 = vadd.f32 %v1619_v21, %v1529_v23  ;;  %1536 = vst.msk [vmem:[#allocation7] sm:$0xff] %vm209_vm8, %v1534_v24 }
0x18a3   :  { %1537 = vst.msk [vmem:[#allocation7 + $0x8] sm:$0xff] %vm209_vm8, %v1535_v25 }
0x18a4   :  { %1977 = shalt.err (!%p1974_p6)
}
0x18a5   :  { %s1978_s5 = scalar_lea.hbm %s2290_s4, 256 }
0x18a6   :  { %p1979_p7 = scmp.ne.s32.totalorder %s2290_s4, %s1978_s5  ;;  %p1982_p8 = scmp.lt.u32.totalorder %s1978_s5, %s2290_s4 }
0x18a8   :  { %p1984_p9 = pnand %p1982_p8, %p1979_p7 }
0x18aa   :  { %1987 = shalt.err (!%p1984_p9)
}
0x18ab   :  { %1549 = dma.vmem_to_hbm [thread:$0]  %s1544_s27, 256, %s2290_s4, [#allocation4], %s1998_s2, %s1998_s2, %s1999_s13  }
0x18ac   :  { %1992 = dma.done.wait [#allocation4], 256  }
0x18ad   :  { %1993 = vsyncadd [#allocation4], 4294967040 }
0x18ae   :  { %1553 = vsyncpa [#allocation3], 1 }
0x18af   :  { %1554 = vsyncpa [#allocation6], 1 }
0x18b0   :  { %1555 = vsyncpa [#allocation4], 1 }

</bundles_post_ra>
